<compile_context>
chip_gen: v7x
topology: tpu7x:2x2x1
jax: 0.10.0
libtpu: 0.0.40
codegen_flags: <defaults>
</compile_context>

<pallas_src>
import functools

import jax
import jax.numpy as jnp
from jax.experimental import pallas as pl
from jax.experimental.pallas import tpu as pltpu


_LAYER_DIMS = [
    (784, 128), (128, 64), (64, 12), (12, 3),     # encoder
    (3, 12), (12, 64), (64, 128), (128, 784),     # decoder
]

_LANE = 128


def _round_up(n, m):
    return ((n + m - 1) // m) * m


# ----------------------------------------------------------------------------
# Kernel: full forward pass (encoder + decoder) for one batch tile.
# Weights (bf16) and biases (f32) are VMEM-resident; activations stay on-chip.
# ----------------------------------------------------------------------------
def _autoencoder_kernel(
    x_ref,
    w1, b1, w2, b2, w3, b3, w4, b4,      # encoder
    w5, b5, w6, b6, w7, b7, w8, b8,      # decoder
    out_ref,
):
    def linear(h_bf16, w_ref, b_ref):
        # bf16 x bf16 matmul on the MXU with f32 accumulation; f32 bias add.
        return (
            jnp.dot(h_bf16, w_ref[...], preferred_element_type=jnp.float32)
            + b_ref[...]
        )

    def relu_bf16(h_f32):
        return jnp.maximum(h_f32, 0.0).astype(jnp.bfloat16)

    h = x_ref[...].astype(jnp.bfloat16)

    # encoder: Linear+ReLU x3, then Linear
    h = relu_bf16(linear(h, w1, b1))
    h = relu_bf16(linear(h, w2, b2))
    h = relu_bf16(linear(h, w3, b3))
    h = linear(h, w4, b4).astype(jnp.bfloat16)

    # decoder: Linear+ReLU x3, then Linear+Tanh (tanh in f32)
    h = relu_bf16(linear(h, w5, b5))
    h = relu_bf16(linear(h, w6, b6))
    h = relu_bf16(linear(h, w7, b7))
    out_ref[...] = jnp.tanh(linear(h, w8, b8)).astype(out_ref.dtype)


# ----------------------------------------------------------------------------
# Tiling / VMEM heuristics
# ----------------------------------------------------------------------------
def _vmem_plan():
    """(tile_b cap, scoped-VMEM limit). v5e/v6e: 128 MiB VMEM; v7x: 64 MiB."""
    try:
        info = pltpu.get_tpu_info()
        phys = getattr(info, "vmem_capacity_bytes", 64 << 20)
    except Exception:
        phys = 64 << 20
    if phys >= (100 << 20):          # v5e / v6e (128 MiB physical VMEM)
        return 4096, 96 << 20
    return 2048, 48 << 20            # v7x (64 MiB per TensorCore)


def _choose_tile_b(batch, cap):
    if batch < 32:
        return batch                 # single tile; block dims equal full array
    # >= 2 grid steps so the "parallel" batch axis shards across both v7x TCs
    # (harmless ~0.35us extra step on single-TC v5e/v6e).
    half = _round_up(_round_up(batch, 16) // 2, 16)
    return min(cap, half)


# ----------------------------------------------------------------------------
# Wrapper
# ----------------------------------------------------------------------------
def autoencoder_forward(x, params, *, tile_b=None, lane_pad_output=False):
    """x: (B, 784), any float dtype (bf16 preferred — no cast pass is added).
    params: flat list [w1, b1, ..., w8, b8]; weights (in, out), biases (1, out).
    Output dtype follows x.dtype. If lane_pad_output, output is (B, 896) with
    columns 784: exactly zero (lane-dense stores)."""
    batch, in_dim = x.shape
    assert in_dim == 784

    # Cast weights to bf16 once (~0.44 MB total; native MXU dtype). Biases stay
    # f32 for the f32 accumulate / bias-add path.
    kernel_params = []
    for i in range(0, len(params), 2):
        kernel_params += [params[i].astype(jnp.bfloat16),
                          params[i + 1].astype(jnp.float32)]

    out_dim = 784
    if lane_pad_output:
        # Lane-dense output: zero-pad last layer's output features 784 -> 896
        # (7*128) so every output lane tile is a full, unmasked store. Zero
        # weight columns + zero bias => padded output lanes are exactly 0.
        out_dim = _round_up(784, _LANE)          # 896
        pad = out_dim - 784
        kernel_params[-2] = jnp.pad(kernel_params[-2], ((0, 0), (0, pad)))
        kernel_params[-1] = jnp.pad(kernel_params[-1], ((0, 0), (0, pad)))

    cap, vmem_limit = _vmem_plan()
    if tile_b is None:
        tile_b = _choose_tile_b(batch, cap)
    tile_b = max(1, min(tile_b, batch))

    # No explicit padding of x: ragged final block is clipped/masked by Pallas.
    grid = (pl.cdiv(batch, tile_b),)

    in_spec = pl.BlockSpec((tile_b, 784), lambda i: (i, 0))
    out_spec = pl.BlockSpec((tile_b, out_dim), lambda i: (i, 0))
    # Resident params: full-shape block, constant block index -> DMA'd once and
    # kept in VMEM across the whole batch grid.
    # TODO(synk): pipeline_mode=pl.Buffered(1) on these constant-index specs
    # would drop the unused second pipeline buffer (~0.5 MB VMEM hygiene).
    param_specs = [
        pl.BlockSpec(p.shape, lambda i: (0, 0)) for p in kernel_params
    ]

    return pl.pallas_call(
        _autoencoder_kernel,
        out_shape=jax.ShapeDtypeStruct((batch, out_dim), x.dtype),
        grid=grid,
        in_specs=[in_spec] + param_specs,
        out_specs=out_spec,
        compiler_params=pltpu.CompilerParams(
            dimension_semantics=("parallel",),
            vmem_limit_bytes=vmem_limit,
        ),
    )(x, *kernel_params)


# ----------------------------------------------------------------------------
# Deterministic parameter init (PyTorch-style uniform(-1/sqrt(in), 1/sqrt(in)))
# ----------------------------------------------------------------------------
def init_params(key):
    params = []
    for i, (fan_in, fan_out) in enumerate(_LAYER_DIMS):
        kw, kb = jax.random.split(jax.random.fold_in(key, i))
        bound = 1.0 / jnp.sqrt(jnp.float32(fan_in))
        # Stored as (in, out), i.e. already transposed vs torch's (out, in).
        w = jax.random.uniform(
            kw, (fan_in, fan_out), jnp.float32, minval=-bound, maxval=bound)
        b = jax.random.uniform(
            kb, (1, fan_out), jnp.float32, minval=-bound, maxval=bound)
        params += [w, b]
    return params


_ACTS = [jax.nn.relu] * 3 + [lambda v: v] + [jax.nn.relu] * 3 + [jnp.tanh]


def reference_forward_f32(x, params):
    """Plain-JAX f32 reference (matches the PyTorch module semantics)."""
    h = x.astype(jnp.float32)
    for i, act in enumerate(_ACTS):
        w, b = params[2 * i], params[2 * i + 1]
        h = act(h @ w + b)
    return h


def reference_forward_bf16(x, params, out_dtype):
    """Plain-JAX reference mirroring the kernel's bf16/f32 mixed precision."""
    h = x.astype(jnp.bfloat16)
    for i, act in enumerate(_ACTS):
        w = params[2 * i].astype(jnp.bfloat16)
        b = params[2 * i + 1].astype(jnp.float32)
        h_f32 = jnp.dot(h, w, preferred_element_type=jnp.float32) + b
        h = act(h_f32)
        if i < len(_ACTS) - 1:
            h = h.astype(jnp.bfloat16)
    return h.astype(out_dtype)


if __name__ == "__main__":
    key = jax.random.PRNGKey(0)
    k_x, k_p = jax.random.split(key)

    params = init_params(k_p)

    # Small shapes: batch=40 exercises >=2 grid steps AND a ragged final block.
    # Producer emits bf16 directly — no extra HBM cast pass in the wrapper.
    batch = 40
    x = jax.random.normal(k_x, (batch, 784), jnp.float32).astype(jnp.bfloat16)

    fwd = jax.jit(functools.partial(autoencoder_forward, lane_pad_output=False))
    fwd_pad = jax.jit(functools.partial(autoencoder_forward, lane_pad_output=True))

    out = jax.block_until_ready(fwd(x, params))
    assert out.shape == (batch, 784) and out.dtype == jnp.bfloat16

    out_pad = jax.block_until_ready(fwd_pad(x, params))
    assert out_pad.shape == (batch, 896) and out_pad.dtype == jnp.bfloat16

    out_f32 = out.astype(jnp.float32)
    ref_bf16 = reference_forward_bf16(x, params, out.dtype).astype(jnp.float32)
    assert jnp.allclose(out_f32, ref_bf16, atol=3e-2, rtol=0), "bf16 ref mismatch"

    # Lane-padded path: real columns match; padded columns are exactly zero.
    pad_real = out_pad[:, :784].astype(jnp.float32)
    assert jnp.allclose(pad_real, ref_bf16, atol=3e-2, rtol=0), "padded-path mismatch"
    assert jnp.all(out_pad[:, 784:] == 0), "padded lanes not zero"

    # Loose check against the pure-f32 PyTorch-semantics reference.
    ref_f32 = reference_forward_f32(x, params)
    assert jnp.allclose(out_f32, ref_f32, atol=0.12, rtol=0), "f32 ref mismatch"

    print("KERNEL_OK")
</pallas_src>

<mosaic_0001>
module attributes {stable_mosaic.version = 11 : i64} {
  func.func @_autoencoder_kernel(%arg0: i32, %arg1: memref<32x784xbf16, #tpu.memory_space<vmem>>, %arg2: memref<784x128xbf16, #tpu.memory_space<vmem>>, %arg3: memref<1x128xf32, #tpu.memory_space<vmem>>, %arg4: memref<128x64xbf16, #tpu.memory_space<vmem>>, %arg5: memref<1x64xf32, #tpu.memory_space<vmem>>, %arg6: memref<64x12xbf16, #tpu.memory_space<vmem>>, %arg7: memref<1x12xf32, #tpu.memory_space<vmem>>, %arg8: memref<12x3xbf16, #tpu.memory_space<vmem>>, %arg9: memref<1x3xf32, #tpu.memory_space<vmem>>, %arg10: memref<3x12xbf16, #tpu.memory_space<vmem>>, %arg11: memref<1x12xf32, #tpu.memory_space<vmem>>, %arg12: memref<12x64xbf16, #tpu.memory_space<vmem>>, %arg13: memref<1x64xf32, #tpu.memory_space<vmem>>, %arg14: memref<64x128xbf16, #tpu.memory_space<vmem>>, %arg15: memref<1x128xf32, #tpu.memory_space<vmem>>, %arg16: memref<128x784xbf16, #tpu.memory_space<vmem>>, %arg17: memref<1x784xf32, #tpu.memory_space<vmem>>, %arg18: memref<32x784xbf16, #tpu.memory_space<vmem>>) attributes {dimension_semantics = [#tpu.dimension_semantics<parallel>], iteration_bounds = array<i64: 2>, scalar_prefetch = 0 : i64, scratch_operands = 0 : i64, tpu.core_type = #tpu.core_type<tc>, window_params = [{transform_indices = @transform_0, window_bounds = array<i64: 32, 784>}, {pipeline_mode = #tpu.pipeline_mode<synchronous>, transform_indices = @transform_1, window_bounds = array<i64: 784, 128>}, {pipeline_mode = #tpu.pipeline_mode<synchronous>, transform_indices = @transform_2, window_bounds = array<i64: 1, 128>}, {pipeline_mode = #tpu.pipeline_mode<synchronous>, transform_indices = @transform_3, window_bounds = array<i64: 128, 64>}, {pipeline_mode = #tpu.pipeline_mode<synchronous>, transform_indices = @transform_4, window_bounds = array<i64: 1, 64>}, {pipeline_mode = #tpu.pipeline_mode<synchronous>, transform_indices = @transform_5, window_bounds = array<i64: 64, 12>}, {pipeline_mode = #tpu.pipeline_mode<synchronous>, transform_indices = @transform_6, window_bounds = array<i64: 1, 12>}, {pipeline_mode = #tpu.pipeline_mode<synchronous>, transform_indices = @transform_7, window_bounds = array<i64: 12, 3>}, {pipeline_mode = #tpu.pipeline_mode<synchronous>, transform_indices = @transform_8, window_bounds = array<i64: 1, 3>}, {pipeline_mode = #tpu.pipeline_mode<synchronous>, transform_indices = @transform_9, window_bounds = array<i64: 3, 12>}, {pipeline_mode = #tpu.pipeline_mode<synchronous>, transform_indices = @transform_10, window_bounds = array<i64: 1, 12>}, {pipeline_mode = #tpu.pipeline_mode<synchronous>, transform_indices = @transform_11, window_bounds = array<i64: 12, 64>}, {pipeline_mode = #tpu.pipeline_mode<synchronous>, transform_indices = @transform_12, window_bounds = array<i64: 1, 64>}, {pipeline_mode = #tpu.pipeline_mode<synchronous>, transform_indices = @transform_13, window_bounds = array<i64: 64, 128>}, {pipeline_mode = #tpu.pipeline_mode<synchronous>, transform_indices = @transform_14, window_bounds = array<i64: 1, 128>}, {pipeline_mode = #tpu.pipeline_mode<synchronous>, transform_indices = @transform_15, window_bounds = array<i64: 128, 784>}, {pipeline_mode = #tpu.pipeline_mode<synchronous>, transform_indices = @transform_16, window_bounds = array<i64: 1, 784>}, {transform_indices = @transform_17, window_bounds = array<i64: 32, 784>}]} {
    %c0 = arith.constant 0 : index
    %c0_0 = arith.constant 0 : index
    %0 = vector.load %arg1[%c0, %c0_0] : memref<32x784xbf16, #tpu.memory_space<vmem>>, vector<32x784xbf16>
    %c0_1 = arith.constant 0 : index
    %c0_2 = arith.constant 0 : index
    %1 = vector.load %arg2[%c0_1, %c0_2] : memref<784x128xbf16, #tpu.memory_space<vmem>>, vector<784x128xbf16>
    %cst = arith.constant dense<0.000000e+00> : vector<32x128xf32>
    %2 = tpu.matmul %0, %1, %cst {dimension_numbers = #tpu.dot_dimension_numbers<[1], [0], [0], [1], [0, 0, 1, 1], [], []>} : vector<32x784xbf16>, vector<784x128xbf16>, vector<32x128xf32> -> vector<32x128xf32>
    %c0_3 = arith.constant 0 : index
    %c0_4 = arith.constant 0 : index
    %3 = vector.load %arg3[%c0_3, %c0_4] : memref<1x128xf32, #tpu.memory_space<vmem>>, vector<1x128xf32>
    %4 = vector.broadcast %3 : vector<1x128xf32> to vector<32x128xf32>
    %5 = arith.addf %2, %4 : vector<32x128xf32>
    %cst_5 = arith.constant 0.000000e+00 : f32
    %6 = vector.broadcast %cst_5 : f32 to vector<32x128xf32>
    %7 = arith.maximumf %5, %6 : vector<32x128xf32>
    %8 = arith.truncf %7 : vector<32x128xf32> to vector<32x128xbf16>
    %c0_6 = arith.constant 0 : index
    %c0_7 = arith.constant 0 : index
    %9 = vector.load %arg4[%c0_6, %c0_7] : memref<128x64xbf16, #tpu.memory_space<vmem>>, vector<128x64xbf16>
    %cst_8 = arith.constant dense<0.000000e+00> : vector<32x64xf32>
    %10 = tpu.matmul %8, %9, %cst_8 {dimension_numbers = #tpu.dot_dimension_numbers<[1], [0], [0], [1], [0, 0, 1, 1], [], []>} : vector<32x128xbf16>, vector<128x64xbf16>, vector<32x64xf32> -> vector<32x64xf32>
    %c0_9 = arith.constant 0 : index
    %c0_10 = arith.constant 0 : index
    %11 = vector.load %arg5[%c0_9, %c0_10] : memref<1x64xf32, #tpu.memory_space<vmem>>, vector<1x64xf32>
    %12 = vector.broadcast %11 : vector<1x64xf32> to vector<32x64xf32>
    %13 = arith.addf %10, %12 : vector<32x64xf32>
    %cst_11 = arith.constant 0.000000e+00 : f32
    %14 = vector.broadcast %cst_11 : f32 to vector<32x64xf32>
    %15 = arith.maximumf %13, %14 : vector<32x64xf32>
    %16 = arith.truncf %15 : vector<32x64xf32> to vector<32x64xbf16>
    %c0_12 = arith.constant 0 : index
    %c0_13 = arith.constant 0 : index
    %17 = vector.load %arg6[%c0_12, %c0_13] : memref<64x12xbf16, #tpu.memory_space<vmem>>, vector<64x12xbf16>
    %cst_14 = arith.constant dense<0.000000e+00> : vector<32x12xf32>
    %18 = tpu.matmul %16, %17, %cst_14 {dimension_numbers = #tpu.dot_dimension_numbers<[1], [0], [0], [1], [0, 0, 1, 1], [], []>} : vector<32x64xbf16>, vector<64x12xbf16>, vector<32x12xf32> -> vector<32x12xf32>
    %c0_15 = arith.constant 0 : index
    %c0_16 = arith.constant 0 : index
    %19 = vector.load %arg7[%c0_15, %c0_16] : memref<1x12xf32, #tpu.memory_space<vmem>>, vector<1x12xf32>
    %20 = vector.broadcast %19 : vector<1x12xf32> to vector<32x12xf32>
    %21 = arith.addf %18, %20 : vector<32x12xf32>
    %cst_17 = arith.constant 0.000000e+00 : f32
    %22 = vector.broadcast %cst_17 : f32 to vector<32x12xf32>
    %23 = arith.maximumf %21, %22 : vector<32x12xf32>
    %24 = arith.truncf %23 : vector<32x12xf32> to vector<32x12xbf16>
    %c0_18 = arith.constant 0 : index
    %c0_19 = arith.constant 0 : index
    %25 = vector.load %arg8[%c0_18, %c0_19] : memref<12x3xbf16, #tpu.memory_space<vmem>>, vector<12x3xbf16>
    %cst_20 = arith.constant dense<0.000000e+00> : vector<32x3xf32>
    %26 = tpu.matmul %24, %25, %cst_20 {dimension_numbers = #tpu.dot_dimension_numbers<[1], [0], [0], [1], [0, 0, 1, 1], [], []>} : vector<32x12xbf16>, vector<12x3xbf16>, vector<32x3xf32> -> vector<32x3xf32>
    %c0_21 = arith.constant 0 : index
    %c0_22 = arith.constant 0 : index
    %27 = vector.load %arg9[%c0_21, %c0_22] : memref<1x3xf32, #tpu.memory_space<vmem>>, vector<1x3xf32>
    %28 = vector.broadcast %27 : vector<1x3xf32> to vector<32x3xf32>
    %29 = arith.addf %26, %28 : vector<32x3xf32>
    %30 = arith.truncf %29 : vector<32x3xf32> to vector<32x3xbf16>
    %c0_23 = arith.constant 0 : index
    %c0_24 = arith.constant 0 : index
    %31 = vector.load %arg10[%c0_23, %c0_24] : memref<3x12xbf16, #tpu.memory_space<vmem>>, vector<3x12xbf16>
    %cst_25 = arith.constant dense<0.000000e+00> : vector<32x12xf32>
    %32 = tpu.matmul %30, %31, %cst_25 {dimension_numbers = #tpu.dot_dimension_numbers<[1], [0], [0], [1], [0, 0, 1, 1], [], []>} : vector<32x3xbf16>, vector<3x12xbf16>, vector<32x12xf32> -> vector<32x12xf32>
    %c0_26 = arith.constant 0 : index
    %c0_27 = arith.constant 0 : index
    %33 = vector.load %arg11[%c0_26, %c0_27] : memref<1x12xf32, #tpu.memory_space<vmem>>, vector<1x12xf32>
    %34 = vector.broadcast %33 : vector<1x12xf32> to vector<32x12xf32>
    %35 = arith.addf %32, %34 : vector<32x12xf32>
    %cst_28 = arith.constant 0.000000e+00 : f32
    %36 = vector.broadcast %cst_28 : f32 to vector<32x12xf32>
    %37 = arith.maximumf %35, %36 : vector<32x12xf32>
    %38 = arith.truncf %37 : vector<32x12xf32> to vector<32x12xbf16>
    %c0_29 = arith.constant 0 : index
    %c0_30 = arith.constant 0 : index
    %39 = vector.load %arg12[%c0_29, %c0_30] : memref<12x64xbf16, #tpu.memory_space<vmem>>, vector<12x64xbf16>
    %cst_31 = arith.constant dense<0.000000e+00> : vector<32x64xf32>
    %40 = tpu.matmul %38, %39, %cst_31 {dimension_numbers = #tpu.dot_dimension_numbers<[1], [0], [0], [1], [0, 0, 1, 1], [], []>} : vector<32x12xbf16>, vector<12x64xbf16>, vector<32x64xf32> -> vector<32x64xf32>
    %c0_32 = arith.constant 0 : index
    %c0_33 = arith.constant 0 : index
    %41 = vector.load %arg13[%c0_32, %c0_33] : memref<1x64xf32, #tpu.memory_space<vmem>>, vector<1x64xf32>
    %42 = vector.broadcast %41 : vector<1x64xf32> to vector<32x64xf32>
    %43 = arith.addf %40, %42 : vector<32x64xf32>
    %cst_34 = arith.constant 0.000000e+00 : f32
    %44 = vector.broadcast %cst_34 : f32 to vector<32x64xf32>
    %45 = arith.maximumf %43, %44 : vector<32x64xf32>
    %46 = arith.truncf %45 : vector<32x64xf32> to vector<32x64xbf16>
    %c0_35 = arith.constant 0 : index
    %c0_36 = arith.constant 0 : index
    %47 = vector.load %arg14[%c0_35, %c0_36] : memref<64x128xbf16, #tpu.memory_space<vmem>>, vector<64x128xbf16>
    %cst_37 = arith.constant dense<0.000000e+00> : vector<32x128xf32>
    %48 = tpu.matmul %46, %47, %cst_37 {dimension_numbers = #tpu.dot_dimension_numbers<[1], [0], [0], [1], [0, 0, 1, 1], [], []>} : vector<32x64xbf16>, vector<64x128xbf16>, vector<32x128xf32> -> vector<32x128xf32>
    %c0_38 = arith.constant 0 : index
    %c0_39 = arith.constant 0 : index
    %49 = vector.load %arg15[%c0_38, %c0_39] : memref<1x128xf32, #tpu.memory_space<vmem>>, vector<1x128xf32>
    %50 = vector.broadcast %49 : vector<1x128xf32> to vector<32x128xf32>
    %51 = arith.addf %48, %50 : vector<32x128xf32>
    %cst_40 = arith.constant 0.000000e+00 : f32
    %52 = vector.broadcast %cst_40 : f32 to vector<32x128xf32>
    %53 = arith.maximumf %51, %52 : vector<32x128xf32>
    %54 = arith.truncf %53 : vector<32x128xf32> to vector<32x128xbf16>
    %c0_41 = arith.constant 0 : index
    %c0_42 = arith.constant 0 : index
    %55 = vector.load %arg16[%c0_41, %c0_42] : memref<128x784xbf16, #tpu.memory_space<vmem>>, vector<128x784xbf16>
    %cst_43 = arith.constant dense<0.000000e+00> : vector<32x784xf32>
    %56 = tpu.matmul %54, %55, %cst_43 {dimension_numbers = #tpu.dot_dimension_numbers<[1], [0], [0], [1], [0, 0, 1, 1], [], []>} : vector<32x128xbf16>, vector<128x784xbf16>, vector<32x784xf32> -> vector<32x784xf32>
    %c0_44 = arith.constant 0 : index
    %c0_45 = arith.constant 0 : index
    %57 = vector.load %arg17[%c0_44, %c0_45] : memref<1x784xf32, #tpu.memory_space<vmem>>, vector<1x784xf32>
    %58 = vector.broadcast %57 : vector<1x784xf32> to vector<32x784xf32>
    %59 = arith.addf %56, %58 : vector<32x784xf32>
    %60 = math.tanh %59 : vector<32x784xf32>
    %61 = arith.truncf %60 : vector<32x784xf32> to vector<32x784xbf16>
    %c0_46 = arith.constant 0 : index
    %c0_47 = arith.constant 0 : index
    %62 = vector.load %arg18[%c0_46, %c0_47] : memref<32x784xbf16, #tpu.memory_space<vmem>>, vector<32x784xbf16>
    tpu.vector_store %arg18[%c0_46, %c0_47], %61 {strides = array<i32>} : memref<32x784xbf16, #tpu.memory_space<vmem>>, vector<32x784xbf16>,
    return
  }
  func.func @transform_0(%arg0: i32) -> (i32, i32) {
    %c0_i32 = arith.constant 0 : i32
    %c0_i32_0 = arith.constant 0 : i32
    return %arg0, %c0_i32 : i32, i32
  }
  func.func @transform_1(%arg0: i32) -> (i32, i32) {
    %c0_i32 = arith.constant 0 : i32
    %c0_i32_0 = arith.constant 0 : i32
    %c0_i32_1 = arith.constant 0 : i32
    return %c0_i32, %c0_i32_0 : i32, i32
  }
  func.func @transform_2(%arg0: i32) -> (i32, i32) {
    %c0_i32 = arith.constant 0 : i32
    %c0_i32_0 = arith.constant 0 : i32
    %c0_i32_1 = arith.constant 0 : i32
    return %c0_i32, %c0_i32_0 : i32, i32
  }
  func.func @transform_3(%arg0: i32) -> (i32, i32) {
    %c0_i32 = arith.constant 0 : i32
    %c0_i32_0 = arith.constant 0 : i32
    %c0_i32_1 = arith.constant 0 : i32
    return %c0_i32, %c0_i32_0 : i32, i32
  }
  func.func @transform_4(%arg0: i32) -> (i32, i32) {
    %c0_i32 = arith.constant 0 : i32
    %c0_i32_0 = arith.constant 0 : i32
    %c0_i32_1 = arith.constant 0 : i32
    return %c0_i32, %c0_i32_0 : i32, i32
  }
  func.func @transform_5(%arg0: i32) -> (i32, i32) {
    %c0_i32 = arith.constant 0 : i32
    %c0_i32_0 = arith.constant 0 : i32
    %c0_i32_1 = arith.constant 0 : i32
    return %c0_i32, %c0_i32_0 : i32, i32
  }
  func.func @transform_6(%arg0: i32) -> (i32, i32) {
    %c0_i32 = arith.constant 0 : i32
    %c0_i32_0 = arith.constant 0 : i32
    %c0_i32_1 = arith.constant 0 : i32
    return %c0_i32, %c0_i32_0 : i32, i32
  }
  func.func @transform_7(%arg0: i32) -> (i32, i32) {
    %c0_i32 = arith.constant 0 : i32
    %c0_i32_0 = arith.constant 0 : i32
    %c0_i32_1 = arith.constant 0 : i32
    return %c0_i32, %c0_i32_0 : i32, i32
  }
  func.func @transform_8(%arg0: i32) -> (i32, i32) {
    %c0_i32 = arith.constant 0 : i32
    %c0_i32_0 = arith.constant 0 : i32
    %c0_i32_1 = arith.constant 0 : i32
    return %c0_i32, %c0_i32_0 : i32, i32
  }
  func.func @transform_9(%arg0: i32) -> (i32, i32) {
    %c0_i32 = arith.constant 0 : i32
    %c0_i32_0 = arith.constant 0 : i32
    %c0_i32_1 = arith.constant 0 : i32
    return %c0_i32, %c0_i32_0 : i32, i32
  }
  func.func @transform_10(%arg0: i32) -> (i32, i32) {
    %c0_i32 = arith.constant 0 : i32
    %c0_i32_0 = arith.constant 0 : i32
    %c0_i32_1 = arith.constant 0 : i32
    return %c0_i32, %c0_i32_0 : i32, i32
  }
  func.func @transform_11(%arg0: i32) -> (i32, i32) {
    %c0_i32 = arith.constant 0 : i32
    %c0_i32_0 = arith.constant 0 : i32
    %c0_i32_1 = arith.constant 0 : i32
    return %c0_i32, %c0_i32_0 : i32, i32
  }
  func.func @transform_12(%arg0: i32) -> (i32, i32) {
    %c0_i32 = arith.constant 0 : i32
    %c0_i32_0 = arith.constant 0 : i32
    %c0_i32_1 = arith.constant 0 : i32
    return %c0_i32, %c0_i32_0 : i32, i32
  }
  func.func @transform_13(%arg0: i32) -> (i32, i32) {
    %c0_i32 = arith.constant 0 : i32
    %c0_i32_0 = arith.constant 0 : i32
    %c0_i32_1 = arith.constant 0 : i32
    return %c0_i32, %c0_i32_0 : i32, i32
  }
  func.func @transform_14(%arg0: i32) -> (i32, i32) {
    %c0_i32 = arith.constant 0 : i32
    %c0_i32_0 = arith.constant 0 : i32
    %c0_i32_1 = arith.constant 0 : i32
    return %c0_i32, %c0_i32_0 : i32, i32
  }
  func.func @transform_15(%arg0: i32) -> (i32, i32) {
    %c0_i32 = arith.constant 0 : i32
    %c0_i32_0 = arith.constant 0 : i32
    %c0_i32_1 = arith.constant 0 : i32
    return %c0_i32, %c0_i32_0 : i32, i32
  }
  func.func @transform_16(%arg0: i32) -> (i32, i32) {
    %c0_i32 = arith.constant 0 : i32
    %c0_i32_0 = arith.constant 0 : i32
    %c0_i32_1 = arith.constant 0 : i32
    return %c0_i32, %c0_i32_0 : i32, i32
  }
  func.func @transform_17(%arg0: i32) -> (i32, i32) {
    %c0_i32 = arith.constant 0 : i32
    %c0_i32_0 = arith.constant 0 : i32
    return %arg0, %c0_i32 : i32, i32
  }
}

</mosaic_0001>

<bundles_post_ra>
// kernel: autoencoder_forward.1
= control target key start
LH: loop header
LB: loop body
LE: loop exit
PB: predicated region body
PF: predicated region fallthrough
CT: control target
= control target key end

     0   :  { %s4096_s0 = inlined_call_operand.vmem [shape: bf16[40,784], index: 0, kind: input, shape index: {}]   ;;  %s4097_s1 = inlined_call_operand.vmem [shape: bf16[784,128], index: 1, kind: input, shape index: {}]   ;;  %s4098_s2 = inlined_call_operand.vmem [shape: f32[1,128], index: 2, kind: input, shape index: {}]   ;;  %s4099_s3 = inlined_call_operand.vmem [shape: bf16[128,64], index: 3, kind: input, shape index: {}]   ;;  %s4100_s4 = inlined_call_operand.vmem [shape: f32[1,64], index: 4, kind: input, shape index: {}]   ;;  %s4101_s5 = inlined_call_operand.vmem [shape: bf16[64,12], index: 5, kind: input, shape index: {}]   ;;  %s4102_s6 = inlined_call_operand.vmem [shape: f32[1,12], index: 6, kind: input, shape index: {}]   ;;  %s4103_s7 = inlined_call_operand.vmem [shape: bf16[12,3], index: 7, kind: input, shape index: {}]   ;;  %s4104_s8 = inlined_call_operand.vmem [shape: f32[1,3], index: 8, kind: input, shape index: {}]   ;;  %s4105_s9 = inlined_call_operand.vmem [shape: bf16[3,12], index: 9, kind: input, shape index: {}]   ;;  %s4106_s10 = inlined_call_operand.vmem [shape: f32[1,12], index: 10, kind: input, shape index: {}]   ;;  %s4107_s11 = inlined_call_operand.vmem [shape: bf16[12,64], index: 11, kind: input, shape index: {}]   ;;  %s4108_s12 = inlined_call_operand.vmem [shape: f32[1,64], index: 12, kind: input, shape index: {}]   ;;  %s4109_s13 = inlined_call_operand.vmem [shape: bf16[64,128], index: 13, kind: input, shape index: {}]   ;;  %s4110_s14 = inlined_call_operand.vmem [shape: f32[1,128], index: 14, kind: input, shape index: {}]   ;;  %s4111_s15 = inlined_call_operand.vmem [shape: bf16[128,784], index: 15, kind: input, shape index: {}]   ;;  %s4112_s16 = inlined_call_operand.vmem [shape: f32[1,784], index: 16, kind: input, shape index: {}]   ;;  %s4113_s17 = inlined_call_operand.hbm [shape: bf16[40,784], index: 17, kind: output, shape index: {}]  }
   0x1   :  { %4123 = sst [smem:[#allocation12_spill]] %s4096_s0 }
   0x2   :  { %4124 = sst [smem:[#allocation13_spill]] %s4097_s1 }
   0x3   :  { %4125 = sst [smem:[#allocation14_spill]] %s4113_s17 }
   0x4   :  { %22 = vsyncpa [#allocation3], 0 }
   0x5   :  { %24 = vsyncpa [#allocation3 + $0x1], 0  ;;  %s3498_s24 = smov 0   ;;  %s3500_s25 = smov 0  }
   0x6   :  { %s3502_s26 = smov 0   ;;  %s3504_s27 = smov 0  }
   0x7 LB: > { %4126 = sst [smem:[#allocation5_spill]] %s3389_s24  ;;  %s3519_s28 = sadd.s32 4294967295, %s3401_s27   ;;  %s3401_s27 = sphi %s3504_s27, %s4142_s27   ;;  %s3397_s26 = sphi %s3502_s26, %s4144_s26   ;;  %s3393_s25 = sphi %s3500_s25, %s4146_s25   ;;  %s3389_s24 = sphi %s3498_s24, %s4145_s24  }
   0x8   : > { %4127 = sst [smem:[#allocation6_spill]] %s3397_s26  ;;  %s2650_s29 = sadd.s32 4294967294, %s3401_s27  }
   0x9   : > { %4128 = sst [smem:[#allocation7_spill]] %s3401_s27  ;;  %s3523_s0 = sadd.s32 1, %s3401_s27  }
   0xa   : > { %4129 = sst [smem:[#allocation8_spill]] %s3519_s28  ;;  %s399_s30 = sadd.s32 1, %s3397_s26 }
   0xb   : > { %4130 = sst [smem:[#allocation9_spill]] %s3523_s0  ;;  %s396_s18 = ssub.s32 %s3401_s27, %s3523_s0 }
   0xc   : > { %p409_p0 = scmp.ne.s32.totalorder %s3397_s26, %s3393_s25  ;;  %p397_p1 = scmp.eq.s32.totalorder %s396_s18, 0 }
   0xd   : > { %p410_p2 = scmp.eq.s32.totalorder %s3519_s28, 1  ;;  %p415_p3 = scmp.ne.s32.totalorder %s3393_s25, %s3389_s24 }
   0xe   : > { %p416_p4 = scmp.eq.s32.totalorder %s2650_s29, 1  ;;  %p2653_p7 = scmp.ge.s32.totalorder %s3401_s27, 1 }
   0xf   : > { %s3534_s19 = scalar_select %p397_p1, %s3397_s26, %s399_s30  }
  0x10   : > { %p3536_p5 = por %p410_p2, %p409_p0  ;;  %p3540_p6 = por %p416_p4, %p415_p3 }
  0x11   : > { %4131 = sst [smem:[#allocation10_spill]] %s3534_s19  ;;  %p502_p8 = scmp.lt.s32.totalorder %s3401_s27, 3 }
  0x12   : > { %s4133_s20 = scalar_select %p3540_p6, 1, 0 }
  0x13   : > { %p503_p9 = pnand %p2653_p7, %p502_p8 }
  0x14   : > { %4134 = sst [smem:[#allocation11_spill]] %s4133_s20  ;;  %s3589_s20 = sshll.u32 (!%p503_p9), %s3519_s28, 2  ;;  %vm1069_vm0 = vcmask (!%p503_p9), 130048   ;;  %v3185_v63 = vld [vmem:[%s4099_s3] sm:$0xff] (!%p503_p9)   ;;  %vm1443_vm1 = vcmask (!%p503_p9), 523264   ;;  %vm1526_vm2 = vcmask (!%p503_p9), 1045504  }
  0x15   : > { %506 = sbr.rel (%p503_p9) target bundleno = 1954 (0x7a2), region = 88  ;;  %s4135_s23 = sld [smem:[#allocation13_spill]] (!%p503_p9)  ;;  %vm1519_vm3 = vcmask (!%p503_p9), 97280   ;;  %vm1596_vm4 = vcmask (!%p503_p9), 1040384   ;;  %vm1597_vm5 = vcmask (!%p503_p9), 1041408   ;;  %vm1589_vm6 = vcmask (!%p503_p9), 23552  }
  0x16   : > { %p566_p10 = scmp.lt.s32.totalorder (!%p503_p9), %s3589_s20, 4  ;;  %s4136_s28 = sld [smem:[#allocation12_spill]] (!%p503_p9)  ;;  %vm2552_vm7 = vcmask (!%p503_p9), 125952  }
  0x17   : > { %s557_s24 = sand.u32 (!%p503_p9), 1, %s3393_s25  }
  0x18   : > { %s3071_s30 = smul.u32 (!%p503_p9), 112, %s557_s24  ;;  %s4035_s22 = scalar_lea.sflag (!%p503_p9), [#allocation3], %s557_s24 }
  0x1a   : > { %s4005_s21 = scalar_lea.vmem (!%p503_p9), [#allocation2], %s3071_s30 }
  0x1b   : > { %v3116_v0 = vld [vmem:[%s4135_s23 + $0x40] sm:$0xff] (!%p503_p9)   ;;  %v3120_v4 = vld [vmem:[%s4135_s23 + $0x48] sm:$0xff] (!%p503_p9)   ;;  %v3124_v8 = vld [vmem:[%s4135_s23 + $0x50] sm:$0xff] (!%p503_p9)  }
  0x1c   : > { %v3117_v1 = vld [vmem:[%s4135_s23] sm:$0xff]   ;;  %2853 = vmatprep.subr.bf16.mxu0 %v3116_v0  ;;  %v3121_v5 = vld [vmem:[%s4135_s23 + $0x8] sm:$0xff]   ;;  %v3125_v9 = vld [vmem:[%s4135_s23 + $0x10] sm:$0xff]   ;;  %s567_s19 = scalar_select %p566_p10, %s3589_s20, 4 }
  0x1d   : > { %v3118_v2 = vld [vmem:[%s4135_s23 + $0xc0] sm:$0xff]   ;;  %2854 = vmatpush3.bf16.msra.mxu0 %v3117_v1  ;;  %v3122_v6 = vld [vmem:[%s4135_s23 + $0xc8] sm:$0xff]   ;;  %v3126_v10 = vld [vmem:[%s4135_s23 + $0xd0] sm:$0xff]  }
  0x1e   : > { %v3119_v3 = vld [vmem:[%s4135_s23 + $0x80] sm:$0xff]   ;;  %2881 = vmatprep.subr.bf16.mxu1 %v3118_v2  ;;  %2855 = vmatprep.subr.bf16.mxu0 %v3120_v4  ;;  %v3123_v7 = vld [vmem:[%s4135_s23 + $0x88] sm:$0xff]   ;;  %v3127_v11 = vld [vmem:[%s4135_s23 + $0x90] sm:$0xff]   ;;  %s3072_s29 = smul.u32 28, %s567_s19  ;;  %s2575_s19 = ssub.s32 (%p3536_p5), 5, %s3589_s20 }
  0x1f   : > { %2882 = vmatpush3.bf16.msra.mxu1 %v3119_v3  ;;  %v3128_v12 = vld [vmem:[%s4135_s23 + $0x58] sm:$0xff]   ;;  %v3132_v16 = vld [vmem:[%s4135_s23 + $0x60] sm:$0xff]   ;;  %v3136_v20 = vld [vmem:[%s4135_s23 + $0x68] sm:$0xff]   ;;  %p2576_p11 = scmp.lt.s32.totalorder (%p3536_p5), %s2575_s19, 4 }
  0x20   : > { %2883 = vmatprep.subr.bf16.mxu1 %v3122_v6  ;;  %v3129_v13 = vld [vmem:[%s4135_s23 + $0x18] sm:$0xff]   ;;  %v3133_v17 = vld [vmem:[%s4135_s23 + $0x20] sm:$0xff]   ;;  %v3137_v21 = vld [vmem:[%s4135_s23 + $0x28] sm:$0xff]   ;;  %s3641_s17 = scalar_lea.vmem %s4136_s28, %s3072_s29 }
  0x21   : > { %2856 = vmatpush3.bf16.msra.mxu0 %v3121_v5  ;;  %v3130_v14 = vld [vmem:[%s4135_s23 + $0xd8] sm:$0xff]   ;;  %v3134_v18 = vld [vmem:[%s4135_s23 + $0xe0] sm:$0xff]   ;;  %v3138_v22 = vld [vmem:[%s4135_s23 + $0xe8] sm:$0xff]  }
  0x22   : > { %2857 = vmatprep.subr.bf16.mxu0 %v3124_v8  ;;  %v3131_v15 = vld [vmem:[%s4135_s23 + $0x98] sm:$0xff]   ;;  %v3135_v19 = vld [vmem:[%s4135_s23 + $0xa0] sm:$0xff]   ;;  %v3139_v23 = vld [vmem:[%s4135_s23 + $0xa8] sm:$0xff]  }
  0x23   : > { %2884 = vmatpush3.bf16.msra.mxu1 %v3123_v7  ;;  %v3140_v24 = vld [vmem:[%s4135_s23 + $0x70] sm:$0xff]   ;;  %v3144_v28 = vld [vmem:[%s4135_s23 + $0x78] sm:$0xff]   ;;  %v3149_v32 = vld [vmem:[%s3641_s17 + $0x4] ss:$28 sps:$4 sm:$0xff]  }
  0x24   : > { %2885 = vmatprep.subr.bf16.mxu1 %v3126_v10  ;;  %v3141_v25 = vld [vmem:[%s4135_s23 + $0x30] sm:$0xff]   ;;  %v3145_v29 = vld [vmem:[%s4135_s23 + $0x38] sm:$0xff]   ;;  %1108 = vmatprep.mubr.bf16.mxu0 %v3149_v32  ;;  %v3151_v34 = vld [vmem:[%s4135_s23 + $0x140] sm:$0xff]  }
  0x25   : > { %2858 = vmatpush3.bf16.msra.mxu0 %v3125_v9  ;;  %v3142_v26 = vld [vmem:[%s4135_s23 + $0xf0] sm:$0xff]   ;;  %v3146_v30 = vld [vmem:[%s4135_s23 + $0xf8] sm:$0xff]   ;;  %v3152_v35 = vld [vmem:[%s3641_s17 + $0x8] ss:$28 sps:$4 sm:$0xff]  }
  0x26   : > { %2859 = vmatprep.subr.bf16.mxu0 %v3128_v12  ;;  %v3143_v27 = vld [vmem:[%s4135_s23 + $0xb0] sm:$0xff]   ;;  %v3147_v31 = vld [vmem:[%s3641_s17] ss:$28 sps:$4 sm:$0xff]   ;;  %v3154_v36 = vld [vmem:[%s3641_s17 + $0xc] ss:$28 sps:$4 sm:$0xff]  }
  0x27   : > { %2886 = vmatpush3.bf16.msra.mxu1 %v3127_v11  ;;  %v3150_v33 = vld [vmem:[%s4135_s23 + $0xb8] sm:$0xff]   ;;  %v3155_v37 = vld [vmem:[%s4135_s23 + $0x100] sm:$0xff]   ;;  %1157 = vmatprep.mubr.bf16.mxu1 %v3154_v36  ;;  %v3156_v38 = vld [vmem:[%s4135_s23 + $0x148] sm:$0xff]  }
  0x28   : > { %2887 = vmatprep.subr.bf16.mxu1 %v3130_v14  ;;  %v3157_v39 = vld [vmem:[%s4135_s23 + $0x108] sm:$0xff]   ;;  %v3158_v40 = vld [vmem:[%s4135_s23 + $0x150] sm:$0xff]   ;;  %v3160_v42 = vld [vmem:[%s4135_s23 + $0x158] sm:$0xff]  }
  0x29   : > { %2860 = vmatpush3.bf16.msra.mxu0 %v3129_v13  ;;  %v3159_v41 = vld [vmem:[%s4135_s23 + $0x110] sm:$0xff]   ;;  %v3164_v43 = vld [vmem:[%s3641_s17 + $0x3c] ss:$28 sps:$4 sm:$0xff]   ;;  %v3162_v46 = vld [vmem:[%s4135_s23 + $0x160] sm:$0xff]  }
  0x2a   : > { %2861 = vmatprep.subr.bf16.mxu0 %v3132_v16  ;;  %v3161_v44 = vld [vmem:[%s4135_s23 + $0x118] sm:$0xff]   ;;  %v3169_v47 = vld [vmem:[%s3641_s17 + $0x44] ss:$28 sps:$4 sm:$0xff]   ;;  %v3166_v50 = vld [vmem:[%s4135_s23 + $0x168] sm:$0xff]  }
  0x2b   : > { %2888 = vmatpush3.bf16.msra.mxu1 %v3131_v15  ;;  %v3167_v45 = vld [vmem:[%s3641_s17 + $0x38] ss:$28 sps:$4 sm:$0xff]   ;;  %v3171_v48 = vld [vmem:[%s3641_s17 + $0x40] ss:$28 sps:$4 sm:$0xff]   ;;  %v3168_v52 = vld [vmem:[%s4135_s23 + $0x128] sm:$0xff]  }
  0x2c   : > { %2889 = vmatprep.subr.bf16.mxu1 %v3134_v18  ;;  %v3163_v49 = vld [vmem:[%s4135_s23 + $0x120] sm:$0xff]   ;;  %v3172_v53 = vld [vmem:[%s4135_s23 + $0x170] sm:$0xff]   ;;  %v3175_v58 = vld [vmem:[%s4135_s23 + $0x178] sm:$0xff]  }
  0x2d   : > { %2862 = vmatpush3.bf16.msra.mxu0 %v3133_v17  ;;  %v3174_v51 = vld [vmem:[%s4135_s23 + $0x180] sm:$0xff]   ;;  %v3179_v54 = vld [vmem:[%s3641_s17 + $0x14] ss:$28 sps:$4 sm:$0xff]   ;;  %v3176_v59 = vld [vmem:[%s4135_s23 + $0x138] sm:$0xff]  }
  0x2e   : > { %2863 = vmatprep.subr.bf16.mxu0 %v3136_v20  ;;  %v3180_v55 = vld [vmem:[%s3641_s17 + $0x18] ss:$28 sps:$4 sm:$0xff]   ;;  %v3181_v56 = vld [vmem:[%s3641_s17 + $0x50] ss:$28 sps:$4 sm:$0xff]   ;;  %v3184_v62 = vld [vmem:[%s3641_s17 + $0x48] ss:$28 sps:$4 sm:$0xff]  }
  0x2f   : > { %2890 = vmatpush3.bf16.msra.mxu1 %v3135_v19  ;;  %v3173_v57 = vld [vmem:[%s4135_s23 + $0x130] sm:$0xff]   ;;  %v3182_v61 = vld [vmem:[%s3641_s17 + $0x4c] ss:$28 sps:$4 sm:$0xff]   ;;  %v3188_v2 = vld [vmem:[%s4099_s3 + $0x18] sm:$0xff]  }
  0x30   : > { %2891 = vmatprep.subr.bf16.mxu1 %v3138_v22  ;;  %v3177_v60 = vld [vmem:[%s3641_s17 + $0x10] ss:$28 sps:$4 sm:$0xff]   ;;  %v3189_v3 = vld [vmem:[%s4099_s3 + $0x20] sm:$0xff]   ;;  %v3192_v6 = vld [vmem:[%s4099_s3 + $0x38] sm:$0xff]  }
  0x31   : > { %2864 = vmatpush3.bf16.msra.mxu0 %v3137_v21  ;;  %v3186_v0 = vld [vmem:[%s4099_s3 + $0x8] sm:$0xff]   ;;  %v3187_v1 = vld [vmem:[%s4099_s3 + $0x10] sm:$0xff]   ;;  %v3193_v7 = vld [vmem:[%s4101_s5] sm:$0xff]  }
  0x32   : > { %2865 = vmatprep.subr.bf16.mxu0 %v3140_v24  ;;  %v3190_v4 = vld [vmem:[%s4099_s3 + $0x28] sm:$0xff]   ;;  %v3191_v5 = vld [vmem:[%s4099_s3 + $0x30] sm:$0xff]   ;;  %v2656_v10 = vld [vmem:[%s4098_s2] ss:$0 sm:$0xff] }
  0x33   : > { %2892 = vmatpush3.bf16.msra.mxu1 %v3139_v23  ;;  %v3194_v8 = vld [vmem:[%s4101_s5 + $0x8] sm:$0xff]  }
  0x34   : > { %2893 = vmatprep.subr.bf16.mxu1 %v3142_v26 }
  0x35   : > { %2866 = vmatpush3.bf16.msra.mxu0 %v3141_v25 }
  0x36   : > { %2867 = vmatprep.subr.bf16.mxu0 %v3144_v28 }
  0x37   : > { %2894 = vmatpush3.bf16.msra.mxu1 %v3143_v27 }
  0x38   : > { %2895 = vmatprep.subr.bf16.mxu1 %v3146_v30 }
  0x39   : > { %2868 = vmatpush3.bf16.msra.mxu0 %v3145_v29 }
  0x3a   : > { %2909 = vmatprep.subr.bf16.mxu0 %v3151_v34 }
  0x3b   : > { %2896 = vmatpush3.bf16.msra.mxu1 %v3150_v33 }
  0x3c   : > { %1109 = vmatmul.mubr.bf16.vlgmr.msra.gmra.mrb[0].mxu0 %v3147_v31  ;;  %2981 = vmatprep.subr.bf16.mxu1 %v3174_v51 }
  0x3d   : > { %2910 = vmatpush3.bf16.msra.mxu0 %v3155_v37  ;;  %1116 = vmatprep.mubr.bf16.mxu0 %v3164_v43 }
  0x3e   : > { %1158 = vmatmul.mubr.bf16.vlgmr.msra.gmra.mrb[0].mxu1 %v3152_v35  ;;  %2911 = vmatprep.subr.bf16.mxu0 %v3156_v38 }
  0x3f   : > { %1165 = vmatprep.mubr.bf16.mxu1 %v3169_v47  ;;  %2982 = vmatpush3.bf16.msra.mxu1 %v3174_v51 }
  0x40   : > { %2987 = vmatprep.subr.bf16.mxu1 %v3185_v63 }
  0x41   : > { %2912 = vmatpush3.bf16.msra.mxu0 %v3157_v39 }
  0x42   : > { %2913 = vmatprep.subr.bf16.mxu0 %v3158_v40 }
  0x44   : > { %1117 = vmatmul.mubr.bf16.gmra.mrb[4].mxu0 %v3167_v45 }
  0x45   : > { %2914 = vmatpush3.bf16.msra.mxu0 %v3159_v41  ;;  %1206 = vmatprep.mubr.bf16.mxu0 %v3179_v54 }
  0x46   : > { %2915 = vmatprep.subr.bf16.mxu0 %v3160_v42  ;;  %1166 = vmatmul.mubr.bf16.gmra.mrb[4].mxu1 %v3171_v48 }
  0x47   : > { %2983 = vmatprep.mubr.msk.bf16.mxu1 %vm1069_vm0, %v3180_v55 }
  0x49   : > { %2916 = vmatpush3.bf16.msra.mxu0 %v3161_v44 }
  0x4a   : > { %2917 = vmatprep.subr.bf16.mxu0 %v3162_v46 }
  0x4d   : > { %2918 = vmatpush3.bf16.msra.mxu0 %v3163_v49 }
  0x4e   : > { %2919 = vmatprep.subr.bf16.mxu0 %v3166_v50  ;;  %2984 = vmatmul.mubr.msk.bf16.vlgmr.msra.gmra.mrb[8].mxu1 %vm1069_vm0, %v3181_v56 }
  0x4f   : > { %2988 = vmatpush3.bf16.msra.mxu1 %v3185_v63 }
  0x50   : > { %2989 = vmatprep.subr.bf16.mxu1 %v3186_v0 }
  0x51   : > { %2920 = vmatpush3.bf16.msra.mxu0 %v3168_v52 }
  0x52   : > { %2921 = vmatprep.subr.bf16.mxu0 %v3172_v53 }
  0x53   : > { %2990 = vmatpush3.bf16.msra.mxu1 %v3186_v0 }
  0x54   : > { %2991 = vmatprep.subr.bf16.mxu1 %v3187_v1 }
  0x55   : > { %2922 = vmatpush3.bf16.msra.mxu0 %v3173_v57 }
  0x56   : > { %2923 = vmatprep.subr.bf16.mxu0 %v3175_v58 }
  0x57   : > { %2992 = vmatpush3.bf16.msra.mxu1 %v3187_v1 }
  0x58   : > { %2993 = vmatprep.subr.bf16.mxu1 %v3188_v2 }
  0x59   : > { %2924 = vmatpush3.bf16.msra.mxu0 %v3176_v59 }
  0x5a   : > { %3007 = vmatprep.subr.bf16.mxu0 %v3193_v7 }
  0x5b   : > { %2994 = vmatpush3.bf16.msra.mxu1 %v3188_v2 }
  0x5c   : > { %1207 = vmatmul.mubr.bf16.vlgmr.msra.gmra.mrb[8].mxu0 %v3177_v60  ;;  %2995 = vmatprep.subr.bf16.mxu1 %v3189_v3 }
  0x5d   : > { %1214 = vmatprep.mubr.bf16.mxu0 %v3182_v61  ;;  %3008 = vmatpush3.bf16.msra.mxu0 %v3193_v7 }
  0x5e   : > { %3009 = vmatprep.subr.bf16.mxu0 %v3194_v8 }
  0x5f   : > { %2996 = vmatpush3.bf16.msra.mxu1 %v3189_v3 }
  0x60   : > { %2997 = vmatprep.subr.bf16.mxu1 %v3190_v4 }
  0x61   : > { %3010 = vmatpush3.bf16.msra.mxu0 %v3194_v8  ;;  %v3195_v8 = vld [vmem:[%s4101_s5 + $0x10] sm:$0xff]  }
  0x62   : > { %3011 = vmatprep.subr.bf16.mxu0 %v3195_v8 }
  0x63   : > { %2998 = vmatpush3.bf16.msra.mxu1 %v3190_v4 }
  0x64   : > { %1215 = vmatmul.mubr.bf16.gmra.mrb[12].mxu0 %v3184_v62  ;;  %2999 = vmatprep.subr.bf16.mxu1 %v3191_v5 }
  0x65   : > { %3012 = vmatpush3.bf16.msra.mxu0 %v3195_v8 }
  0x67   : > { %3000 = vmatpush3.bf16.msra.mxu1 %v3191_v5 }
  0x68   : > { %3001 = vmatprep.subr.bf16.mxu1 %v3192_v6 }
  0x6b   : > { %3002 = vmatpush3.bf16.msra.mxu1 %v3192_v6 }
 0x10f   : > { %v2869_v9 = vpop.f32.mrb[0].mxu0 }
 0x110   : > { %v2870_v11 = vpop.f32.mrb[1].mxu0 }
 0x111   : > { %v2871_v12 = vadd.f32 %v2870_v11, %v2869_v9  ;;  %v2872_v13 = vpop.f32.mrb[2].mxu0  ;;  %v2897_v14 = vpop.f32.mrb[0].mxu1  ;;  %v3196_v9 = vld [vmem:[%s4101_s5 + $0x18] sm:$0xff]  }
 0x112   : > { %v2873_v15 = vpop.f32.mrb[3].mxu0  ;;  %v2898_v18 = vpop.f32.mrb[1].mxu1  ;;  %3013 = vmatprep.subr.bf16.mxu0 %v3196_v9 }
 0x113   : > { %v1111_v16 = vadd.f32 %v2871_v12, %v2656_v10  ;;  %v2874_v17 = vadd.f32 %v2873_v15, %v2872_v13  ;;  %v2899_v19 = vadd.f32 %v2898_v18, %v2897_v14  ;;  %v2900_v20 = vpop.f32.mrb[2].mxu1  ;;  %3014 = vmatpush3.bf16.msra.mxu0 %v3196_v9 }
 0x114   : > { %v2901_v22 = vpop.f32.mrb[3].mxu1 }
 0x115   : > { %v1114_v21 = vadd.f32 %v2874_v17, %v2656_v10  ;;  %v1160_v23 = vadd.f32 %v2899_v19, %v1111_v16  ;;  %v2902_v24 = vadd.f32 %v2901_v22, %v2900_v20 }
 0x117   : > { %v1163_v25 = vadd.f32 %v2902_v24, %v1114_v21  ;;  %v2875_v26 = vpop.f32.mrb[4].mxu0 }
 0x118   : > { %v2876_v27 = vpop.f32.mrb[5].mxu0 }
 0x119   : > { %v2877_v28 = vadd.f32 %v2876_v27, %v2875_v26  ;;  %v2878_v29 = vpop.f32.mrb[6].mxu0  ;;  %v2903_v30 = vpop.f32.mrb[4].mxu1  ;;  %v2731_v27 = vld [vmem:[%s4102_s6] ss:$0 sm:$0xff] }
 0x11a   : > { %v2879_v31 = vpop.f32.mrb[7].mxu0  ;;  %v2904_v34 = vpop.f32.mrb[5].mxu1 }
 0x11b   : > { %v1119_v32 = vadd.f32 %v2877_v28, %v2656_v10  ;;  %v2880_v33 = vadd.f32 %v2879_v31, %v2878_v29  ;;  %v2905_v35 = vadd.f32 %v2904_v34, %v2903_v30  ;;  %v2906_v36 = vpop.f32.mrb[6].mxu1 }
 0x11c   : > { %v2907_v38 = vpop.f32.mrb[7].mxu1 }
 0x11d   : > { %v1122_v37 = vadd.f32 %v2880_v33, %v2656_v10  ;;  %v1168_v39 = vadd.f32 %v2905_v35, %v1119_v32  ;;  %v2908_v40 = vadd.f32 %v2907_v38, %v2906_v36  ;;  %v2722_v10 = vld [vmem:[%s4100_s4] ss:$0 sm:$0xff] }
 0x11f   : > { %v1171_v41 = vadd.f32 %v2908_v40, %v1122_v37 }
 0x121   : > { %v2985_v42 = vpop.f32.mrb[8].mxu1 }
 0x122   : > { %v1257_v43 = vpop.f32.mrb[9].mxu1 }
 0x123   : > { %v2986_v44 = vpop.f32.mrb[10].mxu1 }
 0x124   : > { %v1260_v45 = vpop.f32.mrb[11].mxu1 }
 0x12f   : > { %v2925_v46 = vpop.f32.mrb[8].mxu0 }
 0x130   : > { %v2926_v47 = vpop.f32.mrb[9].mxu0 }
 0x131   : > { %v2927_v48 = vadd.f32 %v2926_v47, %v2925_v46  ;;  %v2928_v49 = vpop.f32.mrb[10].mxu0 }
 0x132   : > { %v2929_v50 = vpop.f32.mrb[11].mxu0 }
 0x133   : > { %v2930_v51 = vadd.f32 %v2929_v50, %v2928_v49  ;;  %v1209_v52 = vadd.f32 %v2927_v48, %v1160_v23  ;;  %v2738_v48 = vld [vmem:[%s4104_s8] ss:$0 sm:$0xff] }
 0x135   : > { %v1258_v53 = vadd.f32 %v1257_v43, %v1209_v52  ;;  %v1212_v54 = vadd.f32 %v2930_v51, %v1163_v25  ;;  %v3197_v25 = vld [vmem:[%s4103_s7] sm:$0x3f]   ;;  %v3403_v43 = vmov 65535  }
 0x136   : > { %3069 = vmatprep.subr.msk.bf16.mxu0 %vm1526_vm2, %v3197_v25  ;;  %v1528_v26 = vsel %vm1526_vm2, %v3197_v25, 0  ;;  %v3227_v25 = vld [vmem:[%s4111_s15 + $0xe0] ss:$28 sps:$4 sm:$0xff]  }
 0x137   : > { %v1261_v55 = vadd.f32 %v1260_v45, %v1212_v54  ;;  %v2931_v56 = vpop.f32.mrb[12].mxu0  ;;  %v1272_v58 = vmax.f32 %v1258_v53, 0.0 }
 0x138   : > { %v2932_v57 = vpop.f32.mrb[13].mxu0 }
 0x139   : > { %v1273_v59 = vmax.f32 %v1261_v55, 0.0  ;;  %v2933_v60 = vadd.f32 %v2932_v57, %v2931_v56  ;;  %v2934_v61 = vpop.f32.mrb[14].mxu0 }
 0x13a   : > { %v2935_v62 = vpop.f32.mrb[15].mxu0 }
 0x13b   : > { %v1276_v63 = vpack.c.bf16 %v1273_v59, %v1272_v58  ;;  %v1217_v0 = vadd.f32 %v2933_v60, %v1168_v39  ;;  %v2936_v1 = vadd.f32 %v2935_v62, %v2934_v61  ;;  %v3198_v58 = vld [vmem:[%s4107_s11] sm:$0x3f]   ;;  %v3200_v61 = vld [vmem:[%s4109_s13 + $0x8] sm:$0xff]  }
 0x13c   : > { %v1679_v59 = vsel %vm1526_vm2, %v3198_v58, 0  ;;  %v3199_v60 = vld [vmem:[%s4109_s13] sm:$0xff]  }
 0x13d   : > { %v1266_v2 = vadd.f32 %v2985_v42, %v1217_v0  ;;  %v1220_v3 = vadd.f32 %v2936_v1, %v1171_v41  ;;  %3003 = vmatprep.mubr.bf16.mxu1 %v1276_v63  ;;  %v1581_v42 = vld [vmem:[%s4105_s9] sm:$0x3] }
 0x13e   : > { %v2742_v62 = vld [vmem:[%s4106_s10] ss:$0 sm:$0xff] }
 0x13f   : > { %v1269_v4 = vadd.f32 %v2986_v44, %v1220_v3  ;;  %v1274_v5 = vmax.f32 %v1266_v2, 0.0  ;;  %v1598_v44 = vsel %vm1596_vm4, 4294967295, %v3403_v43  ;;  %v3206_v43 = vld [vmem:[%s4111_s15 + $0x8] ss:$28 sps:$4 sm:$0xff]  }
 0x140   : > { %v1599_v45 = vsel %vm1597_vm5, %v1598_v44, 0  ;;  %v3214_v44 = vld [vmem:[%s4111_s15 + $0x44] ss:$28 sps:$4 sm:$0xff]  }
 0x141   : > { %v1275_v6 = vmax.f32 %v1269_v4, 0.0  ;;  %v1601_v46 = vand.u32 %v1599_v45, %v1581_v42  ;;  %v3212_v45 = vld [vmem:[%s4111_s15 + $0x40] ss:$28 sps:$4 sm:$0xff]  }
 0x143   : > { %v1277_v7 = vpack.c.bf16 %v1275_v6, %v1274_v5  ;;  %3025 = vmatprep.subr.bf16.mxu1 %v1601_v46 }
 0x145   : > { %3004 = vmatmul.mubr.bf16.vlgmr.msra.gmra.mrb[12].mxu1 %v1277_v7 }
 0x146   : > { %3026 = vmatpush3.bf16.msra.mxu1 %v1601_v46  ;;  %v3220_v46 = vld [vmem:[%s4111_s15 + $0x7c] ss:$28 sps:$4 sm:$0xff]  }
 0x147   : > { %3037 = vmatprep.subr.bf16.mxu1 %v3199_v60 }
 0x218   : > { %v3005_v11 = vpop.f32.mrb[12].mxu1 }
 0x219   : > { %v1392_v12 = vadd.f32 %v3005_v11, %v2722_v10  ;;  %v1383_v13 = vpop.f32.mrb[13].mxu1 }
 0x21a   : > { %v1384_v14 = vadd.f32 %v2722_v10, %v1383_v13  ;;  %v3006_v15 = vpop.f32.mrb[14].mxu1  ;;  %v3201_v13 = vld [vmem:[%s4109_s13 + $0x10] sm:$0xff]  }
 0x21b   : > { %v1395_v16 = vadd.f32 %v3006_v15, %v2722_v10  ;;  %v1386_v17 = vpop.f32.mrb[15].mxu1  ;;  %v1400_v19 = vmax.f32 %v1392_v12, 0.0  ;;  %v3203_v15 = vld [vmem:[%s4111_s15] ss:$28 sps:$4 sm:$0xff]  }
 0x21c   : > { %v1387_v18 = vadd.f32 %v2722_v10, %v1386_v17  ;;  %v1398_v21 = vmax.f32 %v1384_v14, 0.0  ;;  %v3202_v14 = vld [vmem:[%s4109_s13 + $0x18] sm:$0xff]   ;;  %v3208_v17 = vld [vmem:[%s4111_s15 + $0xc] ss:$28 sps:$4 sm:$0xff]  }
 0x21d   : > { %v1401_v20 = vmax.f32 %v1395_v16, 0.0  ;;  %v3205_v16 = vld [vmem:[%s4111_s15 + $0x4] ss:$28 sps:$4 sm:$0xff]  }
 0x21e   : > { %v1399_v22 = vmax.f32 %v1387_v18, 0.0  ;;  %v3211_v18 = vld [vmem:[%s4111_s15 + $0x3c] ss:$28 sps:$4 sm:$0xff]  }
 0x21f   : > { %v1403_v23 = vpack.c.bf16 %v1401_v20, %v1400_v19  ;;  %v3209_v19 = vld [vmem:[%s4111_s15 + $0x38] ss:$28 sps:$4 sm:$0xff]  }
 0x220   : > { %v1402_v24 = vpack.c.bf16 %v1399_v22, %v1398_v21  ;;  %v3217_v20 = vld [vmem:[%s4111_s15 + $0x74] ss:$28 sps:$4 sm:$0xff]   ;;  %v3223_v22 = vld [vmem:[%s4111_s15 + $0xac] ss:$28 sps:$4 sm:$0xff]  }
 0x221   : > { %v3215_v21 = vld [vmem:[%s4111_s15 + $0x70] ss:$28 sps:$4 sm:$0xff]  }
 0x222   : > { %3015 = vmatprep.mubr.msk.bf16.mxu0 %vm1443_vm1, %v1402_v24  ;;  %v3229_v24 = vld [vmem:[%s4111_s15 + $0xe4] ss:$28 sps:$4 sm:$0xff]  }
 0x223   : > { %3016 = vmatmul.mubr.msk.bf16.vlgmr.msra.gmra.mrb[16].mxu0 %vm1443_vm1, %v1403_v23  ;;  %v3221_v23 = vld [vmem:[%s4111_s15 + $0xa8] ss:$28 sps:$4 sm:$0xff]  }
 0x224   : > { %3020 = vmatpush3.bf16.msra.mxu0 %v1528_v26  ;;  %v3235_v26 = vld [vmem:[%s4111_s15 + $0x11c] ss:$28 sps:$4 sm:$0xff]  }
 0x225   : > { %3070 = vmatprep.subr.msk.bf16.mxu0 %vm1526_vm2, %v3198_v58  ;;  %v3247_v58 = vld [vmem:[%s4111_s15 + $0x18c] ss:$28 sps:$4 sm:$0xff]  }
 0x2f6   : > { %v3017_v28 = vpop.f32.mrb[16].mxu0 }
 0x2f7   : > { %v1493_v29 = vadd.f32 %v3017_v28, %v2731_v27  ;;  %v1484_v30 = vpop.f32.mrb[17].mxu0  ;;  %v2745_v28 = vld [vmem:[%s4108_s12] ss:$0 sm:$0xff] }
 0x2f8   : > { %v1485_v31 = vadd.f32 %v2731_v27, %v1484_v30  ;;  %v3018_v32 = vpop.f32.mrb[18].mxu0 }
 0x2f9   : > { %v1496_v33 = vadd.f32 %v3018_v32, %v2731_v27  ;;  %v1487_v34 = vpop.f32.mrb[19].mxu0  ;;  %v1501_v36 = vmax.f32 %v1493_v29, 0.0 }
 0x2fa   : > { %v1488_v35 = vadd.f32 %v2731_v27, %v1487_v34  ;;  %v1499_v38 = vmax.f32 %v1485_v31, 0.0  ;;  %v3233_v27 = vld [vmem:[%s4111_s15 + $0x118] ss:$28 sps:$4 sm:$0xff]  }
 0x2fb   : > { %v1502_v37 = vmax.f32 %v1496_v33, 0.0 }
 0x2fc   : > { %v1500_v39 = vmax.f32 %v1488_v35, 0.0 }
 0x2fd   : > { %v1504_v40 = vpack.c.bf16 %v1502_v37, %v1501_v36 }
 0x2fe   : > { %v1503_v41 = vpack.c.bf16 %v1500_v39, %v1499_v38 }
 0x300   : > { %3021 = vmatprep.mubr.msk.bf16.mxu0 %vm1519_vm3, %v1503_v41 }
 0x301   : > { %3022 = vmatmul.mubr.msk.bf16.vlgmr.msra.gmra.mrb[20].mxu0 %vm1519_vm3, %v1504_v40 }
 0x302   : > { %3032 = vmatpush3.bf16.msra.mxu0 %v1679_v59  ;;  %v3250_v59 = vld [vmem:[%s4111_s15 + $0x194] ss:$28 sps:$4 sm:$0xff]  }
 0x303   : > { %2225 = vmatprep.subr.bf16.mxu0 %v3205_v16 }
 0x3d4   : > { %v3023_v47 = vpop.f32.mrb[20].mxu0 }
 0x3d5   : > { %v1564_v49 = vpop.f32.mrb[21].mxu0  ;;  %v1573_v51 = vadd.f32 %v3023_v47, %v2738_v48  ;;  %v3218_v47 = vld [vmem:[%s4111_s15 + $0x78] ss:$28 sps:$4 sm:$0xff]  }
 0x3d6   : > { %v3024_v50 = vpop.f32.mrb[22].mxu0  ;;  %v1565_v54 = vadd.f32 %v2738_v48, %v1564_v49  ;;  %v3224_v49 = vld [vmem:[%s4111_s15 + $0xb0] ss:$28 sps:$4 sm:$0xff]  }
 0x3d7   : > { %v1576_v52 = vadd.f32 %v3024_v50, %v2738_v48  ;;  %v1567_v53 = vpop.f32.mrb[23].mxu0  ;;  %v3232_v50 = vld [vmem:[%s4111_s15 + $0xec] ss:$28 sps:$4 sm:$0xff]  }
 0x3d8   : > { %v1568_v55 = vadd.f32 %v2738_v48, %v1567_v53  ;;  %v3226_v48 = vld [vmem:[%s4111_s15 + $0xb4] ss:$28 sps:$4 sm:$0xff]   ;;  %v3236_v53 = vld [vmem:[%s4111_s15 + $0x120] ss:$28 sps:$4 sm:$0xff]  }
 0x3d9   : > { %v1580_v56 = vpack.c.bf16 %v1576_v52, %v1573_v51  ;;  %v3230_v51 = vld [vmem:[%s4111_s15 + $0xe8] ss:$28 sps:$4 sm:$0xff]  }
 0x3da   : > { %v1579_v57 = vpack.c.bf16 %v1568_v55, %v1565_v54  ;;  %v3238_v52 = vld [vmem:[%s4111_s15 + $0x124] ss:$28 sps:$4 sm:$0xff]   ;;  %v3241_v54 = vld [vmem:[%s4111_s15 + $0x154] ss:$28 sps:$4 sm:$0xff]   ;;  %v3244_v55 = vld [vmem:[%s4111_s15 + $0x15c] ss:$28 sps:$4 sm:$0xff]  }
 0x3dc   : > { %3027 = vmatprep.mubr.msk.bf16.mxu1 %vm1589_vm6, %v1579_v57  ;;  %v3242_v57 = vld [vmem:[%s4111_s15 + $0x158] ss:$28 sps:$4 sm:$0xff]  }
 0x3dd   : > { %3028 = vmatmul.mubr.msk.bf16.vlgmr.msra.gmra.mrb[16].mxu1 %vm1589_vm6, %v1580_v56  ;;  %v3239_v56 = vld [vmem:[%s4111_s15 + $0x150] ss:$28 sps:$4 sm:$0xff]  }
 0x3de   : > { %3038 = vmatpush3.bf16.msra.mxu1 %v3199_v60  ;;  %v3245_v60 = vld [vmem:[%s4111_s15 + $0x188] ss:$28 sps:$4 sm:$0xff]  }
 0x3df   : > { %3039 = vmatprep.subr.bf16.mxu1 %v3200_v61 }
 0x3e2   : > { %3040 = vmatpush3.bf16.msra.mxu1 %v3200_v61  ;;  %v3248_v61 = vld [vmem:[%s4111_s15 + $0x190] ss:$28 sps:$4 sm:$0xff]  }
 0x3e3   : > { %3041 = vmatprep.subr.bf16.mxu1 %v3201_v13 }
 0x3e6   : > { %3042 = vmatpush3.bf16.msra.mxu1 %v3201_v13 }
 0x3e7   : > { %3043 = vmatprep.subr.bf16.mxu1 %v3202_v14 }
 0x3ea   : > { %3044 = vmatpush3.bf16.msra.mxu1 %v3202_v14 }
 0x3eb   : > { %2278 = vmatprep.subr.bf16.mxu1 %v3208_v17  ;;  %v3257_v17 = vld [vmem:[%s4111_s15 + $0x4c] ss:$28 sps:$4 sm:$0xff]  }
 0x4b0   : > { %v3029_v63 = vpop.f32.mrb[16].mxu1 }
 0x4b1   : > { %v1646_v0 = vadd.f32 %v3029_v63, %v2742_v62  ;;  %v1637_v1 = vpop.f32.mrb[17].mxu1  ;;  %v3254_v63 = vld [vmem:[%s4111_s15 + $0x18] ss:$28 sps:$4 sm:$0xff]  }
 0x4b2   : > { %v1638_v2 = vadd.f32 %v2742_v62, %v1637_v1  ;;  %v3030_v3 = vpop.f32.mrb[18].mxu1  ;;  %v2749_v1 = vld [vmem:[%s4110_s14] ss:$0 sm:$0xff] }
 0x4b3   : > { %v1649_v4 = vadd.f32 %v3030_v3, %v2742_v62  ;;  %v1640_v5 = vpop.f32.mrb[19].mxu1  ;;  %v1654_v7 = vmax.f32 %v1646_v0, 0.0  ;;  %v3404_v0 = vmov 0  }
 0x4b4   : > { %v1641_v6 = vadd.f32 %v2742_v62, %v1640_v5  ;;  %v1652_v9 = vmax.f32 %v1638_v2, 0.0  ;;  %v3253_v62 = vld [vmem:[%s4111_s15 + $0x14] ss:$28 sps:$4 sm:$0xff]  }
 0x4b5   : > { %v1655_v8 = vmax.f32 %v1649_v4, 0.0 }
 0x4b6   : > { %v1653_v10 = vmax.f32 %v1641_v6, 0.0 }
 0x4b7   : > { %v1657_v11 = vpack.c.bf16 %v1655_v8, %v1654_v7 }
 0x4b8   : > { %v1656_v12 = vpack.c.bf16 %v1653_v10, %v1652_v9 }
 0x4ba   : > { %3033 = vmatprep.mubr.msk.bf16.mxu0 %vm1519_vm3, %v1656_v12 }
 0x4bb   : > { %3034 = vmatmul.mubr.msk.bf16.vlgmr.msra.gmra.mrb[24].mxu0 %vm1519_vm3, %v1657_v11 }
 0x4bc   : > { %2226 = vmatpush1.bf16.msra.mxu0 %v3203_v15  ;;  %2257 = vmatprep.mubr.bf16.mxu0 %v3404_v0  ;;  %v3251_v15 = vld [vmem:[%s4111_s15 + $0x10] ss:$28 sps:$4 sm:$0xff]  }
 0x4bd   : > { %2227 = vmatprep.subr.bf16.mxu0 %v3211_v18  ;;  %v3258_v18 = vld [vmem:[%s4111_s15 + $0x50] ss:$28 sps:$4 sm:$0xff]  }
 0x4c0   : > { %2228 = vmatpush1.bf16.msra.mxu0 %v3209_v19  ;;  %v3255_v19 = vld [vmem:[%s4111_s15 + $0x48] ss:$28 sps:$4 sm:$0xff]  }
 0x4c1   : > { %2229 = vmatprep.subr.bf16.mxu0 %v3217_v20  ;;  %v3261_v20 = vld [vmem:[%s4111_s15 + $0x84] ss:$28 sps:$4 sm:$0xff]  }
 0x4c4   : > { %2230 = vmatpush1.bf16.msra.mxu0 %v3215_v21  ;;  %v3262_v21 = vld [vmem:[%s4111_s15 + $0x88] ss:$28 sps:$4 sm:$0xff]  }
 0x4c5   : > { %2231 = vmatprep.subr.bf16.mxu0 %v3223_v22  ;;  %v3259_v22 = vld [vmem:[%s4111_s15 + $0x80] ss:$28 sps:$4 sm:$0xff]  }
 0x4c8   : > { %2232 = vmatpush1.bf16.msra.mxu0 %v3221_v23  ;;  %v3265_v23 = vld [vmem:[%s4111_s15 + $0xbc] ss:$28 sps:$4 sm:$0xff]  }
 0x4c9   : > { %2233 = vmatprep.subr.bf16.mxu0 %v3229_v24  ;;  %v3266_v24 = vld [vmem:[%s4111_s15 + $0xc0] ss:$28 sps:$4 sm:$0xff]  }
 0x4cc   : > { %2234 = vmatpush1.bf16.msra.mxu0 %v3227_v25  ;;  %v3263_v25 = vld [vmem:[%s4111_s15 + $0xb8] ss:$28 sps:$4 sm:$0xff]  }
 0x4cd   : > { %2235 = vmatprep.subr.bf16.mxu0 %v3235_v26  ;;  %v3269_v26 = vld [vmem:[%s4111_s15 + $0xf4] ss:$28 sps:$4 sm:$0xff]  }
 0x4d0   : > { %2236 = vmatpush1.bf16.msra.mxu0 %v3233_v27  ;;  %v3270_v27 = vld [vmem:[%s4111_s15 + $0xf8] ss:$28 sps:$4 sm:$0xff]  }
 0x4d1   : > { %2237 = vmatprep.subr.bf16.mxu0 %v3241_v54 }
 0x4d4   : > { %2238 = vmatpush1.bf16.msra.mxu0 %v3239_v56 }
 0x4d5   : > { %2239 = vmatprep.subr.bf16.mxu0 %v3247_v58 }
 0x4d8   : > { %2240 = vmatpush1.bf16.msra.mxu0 %v3245_v60 }
 0x4d9   : > { %2331 = vmatprep.subr.bf16.mxu0 %v3253_v62 }
 0x58e   : > { %v3035_v29 = vpop.f32.mrb[24].mxu0 }
 0x58f   : > { %v1724_v30 = vadd.f32 %v3035_v29, %v2745_v28  ;;  %v1715_v31 = vpop.f32.mrb[25].mxu0  ;;  %v3273_v29 = vld [vmem:[%s4111_s15 + $0x12c] ss:$28 sps:$4 sm:$0xff]  }
 0x590   : > { %v1716_v32 = vadd.f32 %v2745_v28, %v1715_v31  ;;  %v3036_v33 = vpop.f32.mrb[26].mxu0  ;;  %v3271_v31 = vld [vmem:[%s4111_s15 + $0x128] ss:$28 sps:$4 sm:$0xff]  }
 0x591   : > { %v1727_v34 = vadd.f32 %v3036_v33, %v2745_v28  ;;  %v1718_v35 = vpop.f32.mrb[27].mxu0  ;;  %v1732_v37 = vmax.f32 %v1724_v30, 0.0  ;;  %v3274_v30 = vld [vmem:[%s4111_s15 + $0x130] ss:$28 sps:$4 sm:$0xff]   ;;  %v3278_v33 = vld [vmem:[%s4111_s15 + $0x168] ss:$28 sps:$4 sm:$0xff]  }
 0x592   : > { %v1719_v36 = vadd.f32 %v2745_v28, %v1718_v35  ;;  %v1730_v39 = vmax.f32 %v1716_v32, 0.0  ;;  %v3267_v28 = vld [vmem:[%s4111_s15 + $0xf0] ss:$28 sps:$4 sm:$0xff]   ;;  %v3277_v32 = vld [vmem:[%s4111_s15 + $0x164] ss:$28 sps:$4 sm:$0xff]  }
 0x593   : > { %v1733_v38 = vmax.f32 %v1727_v34, 0.0  ;;  %v3275_v34 = vld [vmem:[%s4111_s15 + $0x160] ss:$28 sps:$4 sm:$0xff]  }
 0x594   : > { %v1731_v40 = vmax.f32 %v1719_v36, 0.0  ;;  %v3281_v35 = vld [vmem:[%s4111_s15 + $0x19c] ss:$28 sps:$4 sm:$0xff]  }
 0x595   : > { %v1735_v41 = vpack.c.bf16 %v1733_v38, %v1732_v37  ;;  %v3282_v36 = vld [vmem:[%s4111_s15 + $0x1a0] ss:$28 sps:$4 sm:$0xff]   ;;  %v3279_v37 = vld [vmem:[%s4111_s15 + $0x198] ss:$28 sps:$4 sm:$0xff]   ;;  %v1902_v38 = vlaneseq }
 0x596   : > { %v1734_v42 = vpack.c.bf16 %v1731_v40, %v1730_v39 }
 0x597   : > { %v3988_v39 = vshrl.u32 %v1902_v38, 7 }
 0x598   : > { %3045 = vmatprep.mubr.msk.bf16.mxu1 %vm1443_vm1, %v1734_v42  ;;  %v3995_v42 = vld [vmem:[%s4112_s16] sm:$0x7f] }
 0x599   : > { %3046 = vmatmul.mubr.msk.bf16.vlgmr.msra.gmra.mrb[20].mxu1 %vm1443_vm1, %v1735_v41  ;;  %v1904_v40 = vsub.s32 0, %v3988_v39  ;;  %v1912_v41 = vsub.s32 2, %v3988_v39 }
 0x59a   : > { %2279 = vmatpush1.bf16.msra.mxu1 %v3206_v43  ;;  %2310 = vmatprep.mubr.bf16.mxu1 %v3404_v0  ;;  %v1908_v43 = vsub.s32 1, %v3988_v39 }
 0x59b   : > { %2280 = vmatprep.subr.bf16.mxu1 %v3214_v44  ;;  %v1916_v44 = vsub.s32 3, %v3988_v39 }
 0x59e   : > { %2281 = vmatpush1.bf16.msra.mxu1 %v3212_v45  ;;  %v1905_v45 = vrot.slane %v3995_v42, %v1904_v40  ;;  %v1924_v40 = vsub.s32 5, %v3988_v39 }
 0x59f   : > { %2282 = vmatprep.subr.bf16.mxu1 %v3220_v46  ;;  %v1913_v46 = vrot.slane %v3995_v42, %v1912_v41 }
 0x5a2   : > { %2283 = vmatpush1.bf16.msra.mxu1 %v3218_v47  ;;  %v1909_v47 = vrot.slane %v3995_v42, %v1908_v43 }
 0x5a3   : > { %2284 = vmatprep.subr.bf16.mxu1 %v3226_v48  ;;  %v1917_v48 = vrot.slane %v3995_v42, %v1916_v44 }
 0x5a6   : > { %2285 = vmatpush1.bf16.msra.mxu1 %v3224_v49 }
 0x5a7   : > { %2286 = vmatprep.subr.bf16.mxu1 %v3232_v50 }
 0x5aa   : > { %2287 = vmatpush1.bf16.msra.mxu1 %v3230_v51 }
 0x5ab   : > { %2288 = vmatprep.subr.bf16.mxu1 %v3238_v52 }
 0x5ae   : > { %2289 = vmatpush1.bf16.msra.mxu1 %v3236_v53 }
 0x5af   : > { %2290 = vmatprep.subr.bf16.mxu1 %v3244_v55 }
 0x5b2   : > { %2291 = vmatpush1.bf16.msra.mxu1 %v3242_v57 }
 0x5b3   : > { %2292 = vmatprep.subr.bf16.mxu1 %v3250_v59 }
 0x5b6   : > { %2293 = vmatpush1.bf16.msra.mxu1 %v3248_v61 }
 0x5b7   : > { %3049 = vmatprep.subr.bf16.mxu1 %v3254_v63 }
 0x66c   : > { %v3047_v2 = vpop.f32.mrb[20].mxu1 }
 0x66d   : > { %v1824_v3 = vadd.f32 %v3047_v2, %v2749_v1  ;;  %v1815_v4 = vpop.f32.mrb[21].mxu1 }
 0x66e   : > { %v1816_v5 = vadd.f32 %v2749_v1, %v1815_v4  ;;  %v3048_v6 = vpop.f32.mrb[22].mxu1 }
 0x66f   : > { %v1827_v7 = vadd.f32 %v3048_v6, %v2749_v1  ;;  %v1818_v8 = vpop.f32.mrb[23].mxu1  ;;  %v1832_v10 = vmax.f32 %v1824_v3, 0.0 }
 0x670   : > { %v1819_v9 = vadd.f32 %v2749_v1, %v1818_v8  ;;  %v1830_v12 = vmax.f32 %v1816_v5, 0.0 }
 0x671   : > { %v1833_v11 = vmax.f32 %v1827_v7, 0.0 }
 0x672   : > { %v1831_v13 = vmax.f32 %v1819_v9, 0.0 }
 0x673   : > { %v3911_v14 = vpack.c.bf16 %v1833_v11, %v1832_v10 }
 0x674   : > { %v1834_v16 = vpack.c.bf16 %v1831_v13, %v1830_v12 }
 0x676   : > { %2258 = vmatmul.mubr.bf16.vlgmr.msra.gmra.mrb[28].mxu0 %v1834_v16  ;;  %2311 = vmatmul.mubr.bf16.vlgmr.msra.gmra.mrb[24].mxu1 %v1834_v16 }
 0x677   : > { %2332 = vmatpush1.bf16.msra.mxu0 %v3251_v15  ;;  %3050 = vmatpush3.bf16.msra.mxu1 %v3254_v63 }
 0x678   : > { %2333 = vmatprep.subr.bf16.mxu0 %v3257_v17  ;;  %3051 = vmatprep.subr.bf16.mxu1 %v3258_v18 }
 0x679   : > { %2267 = vmatprep.mubr.bf16.mxu0 %v3404_v0  ;;  %2320 = vmatprep.mubr.bf16.mxu1 %v3404_v0 }
 0x67b   : > { %2334 = vmatpush1.bf16.msra.mxu0 %v3255_v19  ;;  %3052 = vmatpush3.bf16.msra.mxu1 %v3258_v18 }
 0x67c   : > { %2335 = vmatprep.subr.bf16.mxu0 %v3261_v20  ;;  %3053 = vmatprep.subr.bf16.mxu1 %v3262_v21 }
 0x67e   : > { %2268 = vmatmul.mubr.bf16.gmra.mrb[32].mxu0 %v3911_v14  ;;  %2321 = vmatmul.mubr.bf16.gmra.mrb[28].mxu1 %v3911_v14 }
 0x67f   : > { %2336 = vmatpush1.bf16.msra.mxu0 %v3259_v22  ;;  %3054 = vmatpush3.bf16.msra.mxu1 %v3262_v21 }
 0x680   : > { %3065 = vmatprep.mubr.bf16.mxu1 %v1834_v16  ;;  %2337 = vmatprep.subr.bf16.mxu0 %v3265_v23 }
 0x681   : > { %3055 = vmatprep.subr.bf16.mxu1 %v3266_v24  ;;  %2363 = vmatprep.mubr.bf16.mxu0 %v3404_v0 }
 0x683   : > { %2338 = vmatpush1.bf16.msra.mxu0 %v3263_v25  ;;  %3056 = vmatpush3.bf16.msra.mxu1 %v3266_v24 }
 0x684   : > { %2339 = vmatprep.subr.bf16.mxu0 %v3269_v26  ;;  %3057 = vmatprep.subr.bf16.mxu1 %v3270_v27 }
 0x687   : > { %2340 = vmatpush1.bf16.msra.mxu0 %v3267_v28  ;;  %3058 = vmatpush3.bf16.msra.mxu1 %v3270_v27 }
 0x688   : > { %2341 = vmatprep.subr.bf16.mxu0 %v3273_v29  ;;  %3059 = vmatprep.subr.bf16.mxu1 %v3274_v30 }
 0x68b   : > { %2342 = vmatpush1.bf16.msra.mxu0 %v3271_v31  ;;  %3060 = vmatpush3.bf16.msra.mxu1 %v3274_v30 }
 0x68c   : > { %2343 = vmatprep.subr.bf16.mxu0 %v3277_v32  ;;  %3061 = vmatprep.subr.bf16.mxu1 %v3278_v33 }
 0x68f   : > { %2344 = vmatpush1.bf16.msra.mxu0 %v3275_v34  ;;  %3062 = vmatpush3.bf16.msra.mxu1 %v3278_v33 }
 0x690   : > { %2345 = vmatprep.subr.bf16.mxu0 %v3281_v35  ;;  %3063 = vmatprep.subr.bf16.mxu1 %v3282_v36 }
 0x693   : > { %2346 = vmatpush1.bf16.msra.mxu0 %v3279_v37  ;;  %3064 = vmatpush3.bf16.msra.mxu1 %v3282_v36  ;;  %v1920_v36 = vsub.s32 4, %v3988_v39  ;;  %v1928_v37 = vsub.s32 6, %v3988_v39 }
 0x696   : > { %2364 = vmatmul.mubr.bf16.vlgmr.msra.gmra.mrb[36].mxu0 %v1834_v16  ;;  %3066 = vmatmul.mubr.bf16.vlgmr.msra.gmra.mrb[32].mxu1 %v3911_v14 }
 0x697   : > { %2373 = vmatprep.mubr.bf16.mxu0 %v3404_v0 }
 0x69e   : > { %2374 = vmatmul.mubr.bf16.gmra.mrb[40].mxu0 %v3911_v14 }
 0x749   : > { %v2259_v49 = vpop.f32.mrb[28].mxu0  ;;  %v2312_v50 = vpop.f32.mrb[24].mxu1 }
 0x74a   : > { %v2260_v51 = vadd.f32 %v2259_v49, %v1905_v45  ;;  %v2313_v52 = vadd.f32 %v2312_v50, %v1913_v46  ;;  %v2261_v53 = vpop.f32.mrb[29].mxu0  ;;  %v2314_v54 = vpop.f32.mrb[25].mxu1 }
 0x74b   : > { %v2262_v55 = vadd.f32 %v2261_v53, %v1909_v47  ;;  %v2315_v56 = vadd.f32 %v2314_v54, %v1917_v48  ;;  %v2263_v57 = vpop.f32.mrb[30].mxu0  ;;  %v2316_v58 = vpop.f32.mrb[26].mxu1 }
 0x74c   : > { %3283 = vtanh.f32 %v2260_v51  ;;  %v2264_v59 = vadd.f32 %v2263_v57, %v1905_v45  ;;  %v2265_v60 = vpop.f32.mrb[31].mxu0  ;;  %v2318_v61 = vpop.f32.mrb[27].mxu1  ;;  %v2317_v62 = vadd.f32 %v2316_v58, %v1913_v46 }
 0x74d   : > { %3285 = vtanh.f32 %v2313_v52  ;;  %v2266_v63 = vadd.f32 %v2265_v60, %v1909_v47  ;;  %v2319_v0 = vadd.f32 %v2318_v61, %v1917_v48 }
 0x74e   : > { %3287 = vtanh.f32 %v2262_v55 }
 0x74f   : > { %3289 = vtanh.f32 %v2315_v56 }
 0x750   : > { %3291 = vtanh.f32 %v2264_v59 }
 0x751   : > { %3293 = vtanh.f32 %v2317_v62  ;;  %v2269_v1 = vpop.f32.mrb[32].mxu0  ;;  %v2322_v2 = vpop.f32.mrb[28].mxu1 }
 0x752   : > { %3295 = vtanh.f32 %v2266_v63  ;;  %v2270_v3 = vadd.f32 %v2269_v1, %v1905_v45  ;;  %v2323_v4 = vadd.f32 %v2322_v2, %v1913_v46  ;;  %v2271_v5 = vpop.f32.mrb[33].mxu0  ;;  %v2324_v6 = vpop.f32.mrb[29].mxu1 }
 0x753   : > { %3297 = vtanh.f32 %v2319_v0  ;;  %v2272_v7 = vadd.f32 %v2271_v5, %v1909_v47  ;;  %v2325_v8 = vadd.f32 %v2324_v6, %v1917_v48  ;;  %v2273_v9 = vpop.f32.mrb[34].mxu0  ;;  %v2326_v10 = vpop.f32.mrb[30].mxu1 }
 0x754   : > { %3299 = vtanh.f32 %v2270_v3  ;;  %v2274_v11 = vadd.f32 %v2273_v9, %v1905_v45  ;;  %v2275_v12 = vpop.f32.mrb[35].mxu0  ;;  %v2328_v13 = vpop.f32.mrb[31].mxu1  ;;  %v2327_v14 = vadd.f32 %v2326_v10, %v1913_v46  ;;  %v1921_v46 = vrot.slane %v3995_v42, %v1920_v36 }
 0x755   : > { %3301 = vtanh.f32 %v2323_v4  ;;  %v2276_v16 = vadd.f32 %v2275_v12, %v1909_v47  ;;  %v2329_v18 = vadd.f32 %v2328_v13, %v1917_v48  ;;  %v1929_v47 = vrot.slane %v3995_v42, %v1928_v37 }
 0x756   : > { %v3284_v15 = vpop.eup %3283  ;;  %3303 = vtanh.f32 %v2272_v7  ;;  %v1925_v48 = vrot.slane %v3995_v42, %v1924_v40 }
 0x757   : > { %v3286_v17 = vpop.eup %3285  ;;  %3305 = vtanh.f32 %v2325_v8 }
 0x758   : > { %v3288_v19 = vpop.eup %3287  ;;  %3307 = vtanh.f32 %v2274_v11 }
 0x759   : > { %v3290_v20 = vpop.eup %3289  ;;  %v2837_v21 = vpack.c.bf16 %v3288_v19, %v3284_v15  ;;  %3309 = vtanh.f32 %v2327_v14 }
 0x75a   : > { %v3292_v22 = vpop.eup %3291  ;;  %v2838_v23 = vpack.c.bf16 %v3290_v20, %v3286_v17  ;;  %3311 = vtanh.f32 %v2276_v16 }
 0x75b   : > { %v3294_v24 = vpop.eup %3293  ;;  %2549 = vst [vmem:[%s4005_s21] sm:$0xff] %v2837_v21  ;;  %3313 = vtanh.f32 %v2329_v18 }
 0x75c   : > { %v3296_v25 = vpop.eup %3295  ;;  %2550 = vst [vmem:[%s4005_s21 + $0x8] sm:$0xff] %v2838_v23 }
 0x75d   : > { %v3298_v26 = vpop.eup %3297  ;;  %v2841_v27 = vpack.c.bf16 %v3296_v25, %v3292_v22 }
 0x75e   : > { %v3300_v28 = vpop.eup %3299  ;;  %v2842_v29 = vpack.c.bf16 %v3298_v26, %v3294_v24 }
 0x75f   : > { %v3302_v30 = vpop.eup %3301  ;;  %2554 = vst [vmem:[%s4005_s21 + $0x1c] sm:$0xff] %v2841_v27 }
 0x760   : > { %v3304_v31 = vpop.eup %3303  ;;  %2555 = vst [vmem:[%s4005_s21 + $0x24] sm:$0xff] %v2842_v29 }
 0x761   : > { %v3306_v32 = vpop.eup %3305  ;;  %v2845_v33 = vpack.c.bf16 %v3304_v31, %v3300_v28 }
 0x762   : > { %v3308_v34 = vpop.eup %3307  ;;  %v2846_v35 = vpack.c.bf16 %v3306_v32, %v3302_v30 }
 0x763   : > { %v3310_v38 = vpop.eup %3309  ;;  %2558 = vst [vmem:[%s4005_s21 + $0x38] sm:$0xff] %v2845_v33 }
 0x764   : > { %v3312_v41 = vpop.eup %3311  ;;  %2559 = vst [vmem:[%s4005_s21 + $0x40] sm:$0xff] %v2846_v35 }
 0x765   : > { %v3314_v43 = vpop.eup %3313  ;;  %v2849_v44 = vpack.c.bf16 %v3312_v41, %v3308_v34 }
 0x766   : > { %v2850_v45 = vpack.c.bf16 %v3314_v43, %v3310_v38 }
 0x767   : > { %2562 = vst [vmem:[%s4005_s21 + $0x54] sm:$0xff] %v2849_v44 }
 0x768   : > { %2563 = vst [vmem:[%s4005_s21 + $0x5c] sm:$0xff] %v2850_v45 }
 0x769   : > { %v2365_v49 = vpop.f32.mrb[36].mxu0  ;;  %v3067_v50 = vpop.f32.mrb[32].mxu1 }
 0x76a   : > { %v2366_v51 = vadd.f32 %v2365_v49, %v1921_v46  ;;  %v2427_v52 = vadd.f32 %v3067_v50, %v1929_v47  ;;  %v2367_v53 = vpop.f32.mrb[37].mxu0  ;;  %v2418_v54 = vpop.f32.mrb[33].mxu1 }
 0x76b   : > { %v2368_v39 = vadd.f32 %v2367_v53, %v1925_v48  ;;  %v2419_v55 = vadd.f32 %v2418_v54, %v1929_v47  ;;  %v2369_v56 = vpop.f32.mrb[38].mxu0  ;;  %v3068_v57 = vpop.f32.mrb[34].mxu1 }
 0x76c   : > { %3315 = vtanh.f32 %v2366_v51  ;;  %v2370_v58 = vadd.f32 %v2369_v56, %v1921_v46  ;;  %v2371_v59 = vpop.f32.mrb[39].mxu0  ;;  %v2421_v60 = vpop.f32.mrb[35].mxu1  ;;  %v2430_v61 = vadd.f32 %v3068_v57, %v1929_v47 }
 0x76d   : > { %3317 = vtanh.f32 %v2427_v52  ;;  %v2372_v62 = vadd.f32 %v2371_v59, %v1925_v48  ;;  %v2422_v42 = vadd.f32 %v2421_v60, %v1929_v47 }
 0x76e   : > { %3319 = vtanh.f32 %v2368_v39 }
 0x76f   : > { %3321 = vtanh.f32 %v2419_v55 }
 0x770   : > { %3323 = vtanh.f32 %v2370_v58 }
 0x771   : > { %3325 = vtanh.f32 %v2430_v61  ;;  %v2375_v63 = vpop.f32.mrb[40].mxu0 }
 0x772   : > { %3327 = vtanh.f32 %v2372_v62  ;;  %v2376_v0 = vadd.f32 %v2375_v63, %v1921_v46  ;;  %v2377_v1 = vpop.f32.mrb[41].mxu0 }
 0x773   : > { %3329 = vtanh.f32 %v2422_v42  ;;  %v2378_v2 = vadd.f32 %v2377_v1, %v1925_v48  ;;  %v2379_v3 = vpop.f32.mrb[42].mxu0 }
 0x774   : > { %3331 = vtanh.f32 %v2376_v0  ;;  %v2380_v4 = vadd.f32 %v2379_v3, %v1921_v46  ;;  %v2381_v5 = vpop.f32.mrb[43].mxu0 }
 0x775   : > { %3333 = vtanh.f32 %v2378_v2  ;;  %v2382_v6 = vadd.f32 %v2381_v5, %v1925_v48 }
 0x776   : > { %v3316_v7 = vpop.eup %3315  ;;  %3335 = vtanh.f32 %v2380_v4 }
 0x777   : > { %v3318_v8 = vpop.eup %3317  ;;  %3337 = vtanh.f32 %v2382_v6 }
 0x778   : > { %v3320_v9 = vpop.eup %3319  ;;  %v2848_v10 = vpack.c.bf16 %v3318_v8, %v3318_v8 }
 0x779   : > { %v3322_v11 = vpop.eup %3321  ;;  %v2839_v12 = vpack.c.bf16 %v3320_v9, %v3316_v7 }
 0x77a   : > { %v3324_v13 = vpop.eup %3323  ;;  %2561 = vst.msk [vmem:[%s4005_s21 + $0x50] sm:$0xf] %vm2552_vm7, %v2848_v10  ;;  %v2840_v14 = vpack.c.bf16 %v3322_v11, %v3322_v11 }
 0x77b   : > { %v3326_v15 = vpop.eup %3325  ;;  %2551 = vst [vmem:[%s4005_s21 + $0x10] sm:$0xff] %v2839_v12 }
 0x77c   : > { %v3328_v16 = vpop.eup %3327  ;;  %2553 = vst.msk [vmem:[%s4005_s21 + $0x18] sm:$0xf] %vm2552_vm7, %v2840_v14  ;;  %v2852_v17 = vpack.c.bf16 %v3326_v15, %v3326_v15 }
 0x77d   : > { %v3330_v18 = vpop.eup %3329  ;;  %v2843_v19 = vpack.c.bf16 %v3328_v16, %v3324_v13 }
 0x77e   : > { %v3332_v20 = vpop.eup %3331  ;;  %2565 = vst.msk [vmem:[%s4005_s21 + $0x6c] sm:$0xf] %vm2552_vm7, %v2852_v17  ;;  %v2844_v21 = vpack.c.bf16 %v3330_v18, %v3330_v18  ;;  %2573 = sbr.rel (!%p3536_p5) target bundleno = 1954 (0x7a2), region = 92 }
 0x77f   : > { %v3334_v22 = vpop.eup %3333  ;;  %2556 = vst [vmem:[%s4005_s21 + $0x2c] sm:$0xff] %v2843_v19 }
 0x780   : > { %v3336_v23 = vpop.eup %3335  ;;  %2557 = vst.msk [vmem:[%s4005_s21 + $0x34] sm:$0xf] %vm2552_vm7, %v2844_v21  ;;  %v2847_v24 = vpack.c.bf16 %v3334_v22, %v3332_v20 }
 0x781   : > { %v3338_v25 = vpop.eup %3337 }
 0x782   : > { %2560 = vst [vmem:[%s4005_s21 + $0x48] sm:$0xff] %v2847_v24  ;;  %v2851_v26 = vpack.c.bf16 %v3338_v25, %v3336_v23 }
 0x784   : > { %2564 = vst [vmem:[%s4005_s21 + $0x64] sm:$0xff] %v2851_v26 }
 0x785   : > { %s4148_s19 = smov (!%p2576_p11, %s2575_s19), 4 }
 0x786   : > { %s4040_s18 = smul.u32 448, %s4148_s19 }
 0x788   : > { %s2581_s27 = ssub.s32 1792, %s4040_s18 }
 0x789   : > { %2582 = vsyncadd %s4035_s22, %s2581_s27  ;;  %s4137_s26 = sld [smem:[#allocation8_spill]]  ;;  %p2831_p12 = scmp.ne.s32.totalorder %s4040_s18, 0 }
 0x78a   : > { %s2588_s0 = sshll.u32 %s4005_s21, 4  ;;  %s4138_s28 = sld [smem:[#allocation14_spill]]  ;;  %s4052_s0 = int_to_ptr.vmem [resolvable:$true] %s2588_s0 }
 0x78b   : > { %s3339_s20 = scalar_lea.vmem %s4052_s0, %s4040_s18  ;;  %s3405_s30 = smov [#allocation2]  }
 0x78c   : > { %p3340_p13 = scmp.ne.s32.totalorder %s4052_s0, %s3339_s20  ;;  %s3343_s19 = sshll.u32 %s3405_s30, 4  ;;  %s3344_s19 = int_to_ptr.vmem [resolvable:$false] %s3343_s19 }
 0x78d   : > { %s3345_s27 = scalar_lea.vmem %s3344_s19, 3584  ;;  %p3346_p2 = scmp.lt.s32.totalorder %s4052_s0, %s3344_s19 }
 0x78e   : > { %p3341_p0 = pnand %p3340_p13, %p2831_p12  ;;  %p3347_p3 = scmp.lt.s32.totalorder %s3345_s27, %s3339_s20 }
 0x78f   : > { %s3073_s17 = smul.u32 1792, %s4137_s26 }
 0x790   : > { %p3342_p1 = pneg %p3341_p0  ;;  %p3348_p4 = por %p3347_p3, %p3346_p2 }
 0x791   : > { %s4050_s29 = scalar_lea.hbm %s4138_s28, %s3073_s17 }
 0x792   : > { %p3349_p5 = pnand %p3348_p4, %p3342_p1 }
 0x794   : > { %3352 = shalt.err (!%p3349_p5)
}
 0x795   : > { %s3353_s21 = scalar_lea.hbm %s4050_s29, %s4040_s18  ;;  %s3357_s1 = scalar_lea.hbm %s4138_s28, 2240 }
 0x796   : > { %p3354_p7 = scmp.ne.s32.totalorder %s4050_s29, %s3353_s21  ;;  %p3358_p10 = scmp.lt.u32.totalorder %s4050_s29, %s4138_s28 }
 0x797   : > { %p3359_p11 = scmp.lt.u32.totalorder %s3357_s1, %s3353_s21  ;;  %p3361_p0 = scmp.lt.u32.totalorder %s3353_s21, %s4050_s29 }
 0x798   : > { %p3355_p8 = pnand %p3354_p7, %p2831_p12 }
 0x799   : > { %p3360_p13 = por %p3359_p11, %p3358_p10 }
 0x79a   : > { %p3356_p9 = pneg %p3355_p8 }
 0x79b   : > { %p3362_p1 = por %p3361_p0, %p3360_p13 }
 0x79d   : > { %p3363_p2 = pnand %p3362_p1, %p3356_p9 }
 0x79f   : > { %3366 = shalt.err (!%p3363_p2)
}
 0x7a0   : > { %s3406_s30 = smov 448   ;;  %s3407_s19 = smov 28  }
 0x7a1   : > { %2594 = dma.vmem_to_hbm [thread:$0]  (%p2831_p12), %s4052_s0, %s4040_s18, %s4050_s29, %s4035_s22, %s3406_s30, %s3406_s30, %s3407_s19  }
 0x7a2 PF: > { %s4139_s27 = sld [smem:[#allocation7_spill]]  ;;  %s4140_s26 = sld [smem:[#allocation5_spill]] }
 0x7a8   : > { %p3079_p3 = scmp.ge.s32.totalorder %s4139_s27, 2  ;;  %s2603_s1 = sand.u32 1, %s4140_s26  }
 0x7a9   : > { %s2604_s21 = scalar_lea.sflag [#allocation3], %s2603_s1 }
 0x7aa   : > { %p3076_p4 = pnand %p3079_p3, %p3540_p6 }
 0x7ac   : > { %3384 = dma.done.wait (!%p3076_p4), %s2604_s21, 1792  }
 0x7ad   : > { %3386 = vsyncadd (!%p3076_p4), %s2604_s21, 4294965504  ;;  %s4142_s27 = sld [smem:[#allocation9_spill]]  ;;  %s4143_s20 = sld [smem:[#allocation6_spill]] }
 0x7ae   : > { %s4144_s26 = sld [smem:[#allocation10_spill]]  ;;  %s4145_s24 = smov %s3393_s25 }
 0x7b3   : > { %p27_p5 = scmp.ge.s32.totalorder %s4142_s27, 4   ;;  %s4146_s25 = smov %s4143_s20 }
 0x7b5   :  { %29 = sbr.rel (!%p27_p5) target bundleno = 7 (0x7), region = 123 }
 0x7bc   :  { %2609 = vsyncpa [#allocation3], 1 }
 0x7bd   :  { %2611 = vsyncpa [#allocation3 + $0x1], 1 }

</bundles_post_ra>
